<compile_context>
chip_gen: v7x
topology: tpu7x:2x2x1
jax: 0.10.0
libtpu: 0.0.40
codegen_flags: <defaults>
</compile_context>

<pallas_src>
import functools

import jax
import jax.numpy as jnp
from jax.experimental import pallas as pl
from jax.experimental.pallas import tpu as pltpu


# ---------------------------------------------------------------------------
# Fused CharRNN kernel.
# Gate order follows PyTorch: [i, f, g, o]; biases are pre-summed (b_ih + b_hh).
# ---------------------------------------------------------------------------
def _char_rnn_kernel(*refs, n_layers):
    # ---- unpack refs -------------------------------------------------------
    pos = 0
    x_ref = refs[pos]; pos += 1                      # (T*B, V)   time-major rows
    layers = []
    for _ in range(n_layers):
        layers.append((refs[pos], refs[pos + 1], refs[pos + 2]))   # W_ih, W_hh, b
        pos += 3
    fcw_ref, fcb_ref, h0_ref, c0_ref = refs[pos:pos + 4]; pos += 4
    logits_ref, hN_ref, cN_ref = refs[pos:pos + 3]; pos += 3
    gx_sc, y_sc = refs[pos], refs[pos + 1]           # VMEM scratch (T*B,4H), (T*B,H)

    H = h0_ref.shape[-1]
    B = h0_ref.shape[-2]
    T = x_ref.shape[0] // B

    # ---- stacked LSTM layers ----------------------------------------------
    for layer in range(n_layers):
        wih_ref, whh_ref, b_ref = layers[layer]

        # Hoisted input projection: one big MXU matmul over all T*B rows.
        xin = x_ref[...] if layer == 0 else y_sc[...]
        gx_sc[...] = (jnp.dot(xin, wih_ref[...],
                              preferred_element_type=jnp.float32)
                      + b_ref[...])                  # (T*B, 4H)

        whh = whh_ref[...]                           # (H, 4H), loop-invariant
        h0 = h0_ref[layer]                           # (B, H)
        c0 = c0_ref[layer]                           # (B, H)

        def step(t, carry):
            h, c = carry
            row = pl.multiple_of(t * B, B)
            # Only the recurrent term stays inside the sequential loop.
            gates = gx_sc[pl.ds(row, B), :] + jnp.dot(
                h, whh, preferred_element_type=jnp.float32)      # (B, 4H)
            # NOTE: for H >= 128 these gate slices are 128-lane aligned.
            i_g = jax.nn.sigmoid(gates[:, 0 * H:1 * H])
            f_g = jax.nn.sigmoid(gates[:, 1 * H:2 * H])
            g_g = jnp.tanh(gates[:, 2 * H:3 * H])
            o_g = jax.nn.sigmoid(gates[:, 3 * H:4 * H])
            c_new = f_g * c + i_g * g_g
            h_new = o_g * jnp.tanh(c_new)
            y_sc[pl.ds(row, B), :] = h_new           # per-step hidden -> VMEM scratch
            return (h_new, c_new)

        h_fin, c_fin = jax.lax.fori_loop(0, T, step, (h0, c0),
                                         unroll=(T <= 32))
        hN_ref[layer] = h_fin.astype(hN_ref.dtype)
        cN_ref[layer] = c_fin.astype(cN_ref.dtype)

    # TODO(synk): nn.Dropout(p=0.5) is identity in eval mode; training-mode dropout
    # (pltpu.prng_random_bits mask) not implemented.

    # ---- fused FC head: one (T*B, H) @ (H, Vp) matmul, lane-dense output ----
    logits_ref[...] = (jnp.dot(y_sc[...], fcw_ref[...],
                               preferred_element_type=jnp.float32)
                       + fcb_ref[...]).astype(logits_ref.dtype)


def _full_spec(shape):
    """Whole-array VMEM block (no grid)."""
    return pl.BlockSpec(tuple(shape), lambda: (0,) * len(shape))


# ---------------------------------------------------------------------------
# CharRNN forward
# ---------------------------------------------------------------------------
def char_rnn_forward(params, x, hc):
    """x: (B, T, V) one-hot floats (batch_first, like PyTorch);
    hc: (h0, c0), each (n_layers, B, H).
    Returns (logits (B*T, V), (h, c) each (n_layers, B, H))."""
    h0_all, c0_all = hc
    L, B, H = h0_all.shape
    _, T, V = x.shape

    # Time-major, flattened rows: row t*B + b. Single cheap relayout of the input.
    x_tm = jnp.transpose(x, (1, 0, 2)).reshape(T * B, V)

    # Pad FC output dim to a multiple of 128 lanes (unmasked vst on the store);
    # padded columns are zero and sliced off below.
    fc_w, fc_b = params["fc_w"], params["fc_b"]
    V_out = fc_w.shape[1]
    Vp = ((V_out + 127) // 128) * 128
    if Vp != V_out:
        fc_w = jnp.pad(fc_w, ((0, 0), (0, Vp - V_out)))
        fc_b = jnp.pad(fc_b, ((0, 0), (0, Vp - V_out)))

    args = [x_tm]
    for (w_ih, w_hh, b) in params["lstm"]:
        args += [w_ih, w_hh, b]
    args += [fc_w, fc_b, h0_all, c0_all]

    kernel = functools.partial(_char_rnn_kernel, n_layers=L)

    logits_tm, hN, cN = pl.pallas_call(
        kernel,
        out_shape=(jax.ShapeDtypeStruct((T * B, Vp), jnp.float32),
                   jax.ShapeDtypeStruct((L, B, H), jnp.float32),
                   jax.ShapeDtypeStruct((L, B, H), jnp.float32)),
        in_specs=[_full_spec(a.shape) for a in args],
        out_specs=(_full_spec((T * B, Vp)),
                   _full_spec((L, B, H)),
                   _full_spec((L, B, H))),
        scratch_shapes=[pltpu.VMEM((T * B, 4 * H), jnp.float32),   # gate scratch
                        pltpu.VMEM((T * B, H), jnp.float32)],      # layer output
        # For realistic sizes: raise vmem_limit_bytes via pltpu.CompilerParams(...)
    )(*args)

    # Reorder rows (t, b) -> (b, t) to match PyTorch's batch_first reshape(-1, H),
    # and drop the lane padding.
    logits = jnp.transpose(logits_tm.reshape(T, B, Vp), (1, 0, 2))
    logits = logits.reshape(B * T, Vp)[:, :V_out]
    return logits, (hN, cN)


# ---------------------------------------------------------------------------
# Pure-JAX reference (for correctness check only)
# ---------------------------------------------------------------------------
def _reference_forward(params, x, hc):
    h_all, c_all = hc
    B, T, _ = x.shape
    seq = x
    hs, cs = [], []
    for l, (w_ih, w_hh, b) in enumerate(params["lstm"]):
        h, c = h_all[l], c_all[l]
        H = h.shape[-1]
        outs = []
        for t in range(T):
            gates = seq[:, t, :] @ w_ih + h @ w_hh + b
            i = jax.nn.sigmoid(gates[:, 0 * H:1 * H])
            f = jax.nn.sigmoid(gates[:, 1 * H:2 * H])
            g = jnp.tanh(gates[:, 2 * H:3 * H])
            o = jax.nn.sigmoid(gates[:, 3 * H:4 * H])
            c = f * c + i * g
            h = o * jnp.tanh(c)
            outs.append(h)
        seq = jnp.stack(outs, axis=1)
        hs.append(h)
        cs.append(c)
    y = seq.reshape(-1, seq.shape[-1])
    logits = y @ params["fc_w"] + params["fc_b"]
    return logits, (jnp.stack(hs), jnp.stack(cs))


def init_params(key, vocab, hidden, n_layers):
    """Deterministic synthetic init matching PyTorch shapes.
    LSTM: uniform(-1/sqrt(H), 1/sqrt(H)); fc weight uniform(-1,1), fc bias 0."""
    params = {"lstm": []}
    bound = 1.0 / jnp.sqrt(jnp.float32(hidden))
    for layer in range(n_layers):
        din = vocab if layer == 0 else hidden
        key, k1, k2, k3, k4 = jax.random.split(key, 5)
        # PyTorch stores (4H, D); we pre-transpose to (D, 4H) for the kernel.
        w_ih = jax.random.uniform(k1, (din, 4 * hidden), jnp.float32, -bound, bound)
        w_hh = jax.random.uniform(k2, (hidden, 4 * hidden), jnp.float32, -bound, bound)
        b_ih = jax.random.uniform(k3, (4 * hidden,), jnp.float32, -bound, bound)
        b_hh = jax.random.uniform(k4, (4 * hidden,), jnp.float32, -bound, bound)
        params["lstm"].append((w_ih, w_hh, (b_ih + b_hh)[None, :]))
    key, kw = jax.random.split(key)
    params["fc_w"] = jax.random.uniform(kw, (hidden, vocab), jnp.float32, -1.0, 1.0)
    params["fc_b"] = jnp.zeros((1, vocab), jnp.float32)
    return params


if __name__ == "__main__":
    B, T, V, H, L = 2, 8, 32, 32, 2   # batch, seq, vocab (len(tokens)), n_hidden, n_layers

    key = jax.random.PRNGKey(0)
    key, kx = jax.random.split(key)
    # one-hot character inputs, shape (B, T, V)
    idx = jax.random.randint(kx, (B, T), 0, V)
    x = jax.nn.one_hot(idx, V, dtype=jnp.float32)

    h0 = jnp.zeros((L, B, H), jnp.float32)
    c0 = jnp.zeros((L, B, H), jnp.float32)

    params = init_params(key, V, H, L)

    logits, (h, c) = jax.jit(char_rnn_forward)(params, x, (h0, c0))
    jax.block_until_ready((logits, h, c))

    assert logits.shape == (B * T, V)
    assert h.shape == (L, B, H) and c.shape == (L, B, H)

    # Correctness vs pure-JAX reference
    ref_logits, (ref_h, ref_c) = _reference_forward(params, x, (h0, c0))
    assert jnp.allclose(logits, ref_logits, rtol=1e-4, atol=1e-4)
    assert jnp.allclose(h, ref_h, rtol=1e-4, atol=1e-4)
    assert jnp.allclose(c, ref_c, rtol=1e-4, atol=1e-4)

    print("KERNEL_OK")
</pallas_src>

<mosaic_0001>
module attributes {stable_mosaic.version = 11 : i64} {
  func.func @_char_rnn_kernel(%arg0: memref<16x32xf32, #tpu.memory_space<vmem>>, %arg1: memref<32x128xf32, #tpu.memory_space<vmem>>, %arg2: memref<32x128xf32, #tpu.memory_space<vmem>>, %arg3: memref<1x128xf32, #tpu.memory_space<vmem>>, %arg4: memref<32x128xf32, #tpu.memory_space<vmem>>, %arg5: memref<32x128xf32, #tpu.memory_space<vmem>>, %arg6: memref<1x128xf32, #tpu.memory_space<vmem>>, %arg7: memref<32x128xf32, #tpu.memory_space<vmem>>, %arg8: memref<1x128xf32, #tpu.memory_space<vmem>>, %arg9: memref<2x2x32xf32, #tpu.memory_space<vmem>>, %arg10: memref<2x2x32xf32, #tpu.memory_space<vmem>>, %arg11: memref<16x128xf32, #tpu.memory_space<vmem>>, %arg12: memref<2x2x32xf32, #tpu.memory_space<vmem>>, %arg13: memref<2x2x32xf32, #tpu.memory_space<vmem>>, %arg14: memref<16x128xf32, #tpu.memory_space<vmem>>, %arg15: memref<16x32xf32, #tpu.memory_space<vmem>>) attributes {dimension_semantics = [], scalar_prefetch = 0 : i64, scratch_operands = 2 : i64, tpu.core_type = #tpu.core_type<tc>} {
    %c0 = arith.constant 0 : index
    %c0_0 = arith.constant 0 : index
    %0 = vector.load %arg0[%c0, %c0_0] : memref<16x32xf32, #tpu.memory_space<vmem>>, vector<16x32xf32>
    %c0_1 = arith.constant 0 : index
    %c0_2 = arith.constant 0 : index
    %1 = vector.load %arg1[%c0_1, %c0_2] : memref<32x128xf32, #tpu.memory_space<vmem>>, vector<32x128xf32>
    %cst = arith.constant dense<0.000000e+00> : vector<16x128xf32>
    %2 = tpu.matmul %0, %1, %cst {dimension_numbers = #tpu.dot_dimension_numbers<[1], [0], [0], [1], [0, 0, 1, 1], [], []>} : vector<16x32xf32>, vector<32x128xf32>, vector<16x128xf32> -> vector<16x128xf32>
    %c0_3 = arith.constant 0 : index
    %c0_4 = arith.constant 0 : index
    %3 = vector.load %arg3[%c0_3, %c0_4] : memref<1x128xf32, #tpu.memory_space<vmem>>, vector<1x128xf32>
    %4 = vector.broadcast %3 : vector<1x128xf32> to vector<16x128xf32>
    %5 = arith.addf %2, %4 : vector<16x128xf32>
    %c0_5 = arith.constant 0 : index
    %c0_6 = arith.constant 0 : index
    %6 = vector.load %arg14[%c0_5, %c0_6] : memref<16x128xf32, #tpu.memory_space<vmem>>, vector<16x128xf32>
    tpu.vector_store %arg14[%c0_5, %c0_6], %5 {strides = array<i32>} : memref<16x128xf32, #tpu.memory_space<vmem>>, vector<16x128xf32>,
    %c0_7 = arith.constant 0 : index
    %c0_8 = arith.constant 0 : index
    %7 = vector.load %arg2[%c0_7, %c0_8] : memref<32x128xf32, #tpu.memory_space<vmem>>, vector<32x128xf32>
    %c0_9 = arith.constant 0 : index
    %c0_10 = arith.constant 0 : index
    %c0_11 = arith.constant 0 : index
    %8 = vector.load %arg9[%c0_9, %c0_10, %c0_11] : memref<2x2x32xf32, #tpu.memory_space<vmem>>, vector<1x2x32xf32>
    %9 = vector.shape_cast %8 : vector<1x2x32xf32> to vector<2x32xf32>
    %c0_12 = arith.constant 0 : index
    %c0_13 = arith.constant 0 : index
    %c0_14 = arith.constant 0 : index
    %10 = vector.load %arg10[%c0_12, %c0_13, %c0_14] : memref<2x2x32xf32, #tpu.memory_space<vmem>>, vector<1x2x32xf32>
    %11 = vector.shape_cast %10 : vector<1x2x32xf32> to vector<2x32xf32>
    %c0_i32 = arith.constant 0 : i32
    %c2_i32 = arith.constant 2 : i32
    %12 = arith.muli %c0_i32, %c2_i32 : i32
    %13 = tpu.assume_multiple %12, 2 : i32
    %14 = arith.index_cast %13 : i32 to index
    %c0_15 = arith.constant 0 : index
    %15 = vector.load %arg14[%14, %c0_15] : memref<16x128xf32, #tpu.memory_space<vmem>>, vector<2x128xf32>
    %cst_16 = arith.constant dense<0.000000e+00> : vector<2x128xf32>
    %16 = tpu.matmul %9, %7, %cst_16 {dimension_numbers = #tpu.dot_dimension_numbers<[1], [0], [0], [1], [0, 0, 1, 1], [], []>} : vector<2x32xf32>, vector<32x128xf32>, vector<2x128xf32> -> vector<2x128xf32>
    %17 = arith.addf %15, %16 : vector<2x128xf32>
    %18 = vector.extract_strided_slice %17 {offsets = [0, 0], sizes = [2, 32], strides = [1, 1]} : vector<2x128xf32> to vector<2x32xf32>
    %19 = arith.negf %18 : vector<2x32xf32>
    %20 = math.exp %19 : vector<2x32xf32>
    %cst_17 = arith.constant 1.000000e+00 : f32
    %21 = vector.broadcast %cst_17 : f32 to vector<2x32xf32>
    %22 = arith.addf %21, %20 : vector<2x32xf32>
    %23 = arith.divf %21, %22 : vector<2x32xf32>
    %24 = vector.extract_strided_slice %17 {offsets = [0, 32], sizes = [2, 32], strides = [1, 1]} : vector<2x128xf32> to vector<2x32xf32>
    %25 = arith.negf %24 : vector<2x32xf32>
    %26 = math.exp %25 : vector<2x32xf32>
    %cst_18 = arith.constant 1.000000e+00 : f32
    %27 = vector.broadcast %cst_18 : f32 to vector<2x32xf32>
    %28 = arith.addf %27, %26 : vector<2x32xf32>
    %29 = arith.divf %27, %28 : vector<2x32xf32>
    %30 = vector.extract_strided_slice %17 {offsets = [0, 64], sizes = [2, 32], strides = [1, 1]} : vector<2x128xf32> to vector<2x32xf32>
    %31 = math.tanh %30 : vector<2x32xf32>
    %32 = vector.extract_strided_slice %17 {offsets = [0, 96], sizes = [2, 32], strides = [1, 1]} : vector<2x128xf32> to vector<2x32xf32>
    %33 = arith.negf %32 : vector<2x32xf32>
    %34 = math.exp %33 : vector<2x32xf32>
    %cst_19 = arith.constant 1.000000e+00 : f32
    %35 = vector.broadcast %cst_19 : f32 to vector<2x32xf32>
    %36 = arith.addf %35, %34 : vector<2x32xf32>
    %37 = arith.divf %35, %36 : vector<2x32xf32>
    %38 = arith.mulf %29, %11 : vector<2x32xf32>
    %39 = arith.mulf %23, %31 : vector<2x32xf32>
    %40 = arith.addf %38, %39 : vector<2x32xf32>
    %41 = math.tanh %40 : vector<2x32xf32>
    %42 = arith.mulf %37, %41 : vector<2x32xf32>
    %43 = arith.index_cast %13 : i32 to index
    %c0_20 = arith.constant 0 : index
    %44 = vector.load %arg15[%43, %c0_20] : memref<16x32xf32, #tpu.memory_space<vmem>>, vector<2x32xf32>
    tpu.vector_store %arg15[%43, %c0_20], %42 {strides = array<i32>} : memref<16x32xf32, #tpu.memory_space<vmem>>, vector<2x32xf32>,
    %c1_i32 = arith.constant 1 : i32
    %c2_i32_21 = arith.constant 2 : i32
    %45 = arith.muli %c1_i32, %c2_i32_21 : i32
    %46 = tpu.assume_multiple %45, 2 : i32
    %47 = arith.index_cast %46 : i32 to index
    %c0_22 = arith.constant 0 : index
    %48 = vector.load %arg14[%47, %c0_22] : memref<16x128xf32, #tpu.memory_space<vmem>>, vector<2x128xf32>
    %cst_23 = arith.constant dense<0.000000e+00> : vector<2x128xf32>
    %49 = tpu.matmul %42, %7, %cst_23 {dimension_numbers = #tpu.dot_dimension_numbers<[1], [0], [0], [1], [0, 0, 1, 1], [], []>} : vector<2x32xf32>, vector<32x128xf32>, vector<2x128xf32> -> vector<2x128xf32>
    %50 = arith.addf %48, %49 : vector<2x128xf32>
    %51 = vector.extract_strided_slice %50 {offsets = [0, 0], sizes = [2, 32], strides = [1, 1]} : vector<2x128xf32> to vector<2x32xf32>
    %52 = arith.negf %51 : vector<2x32xf32>
    %53 = math.exp %52 : vector<2x32xf32>
    %cst_24 = arith.constant 1.000000e+00 : f32
    %54 = vector.broadcast %cst_24 : f32 to vector<2x32xf32>
    %55 = arith.addf %54, %53 : vector<2x32xf32>
    %56 = arith.divf %54, %55 : vector<2x32xf32>
    %57 = vector.extract_strided_slice %50 {offsets = [0, 32], sizes = [2, 32], strides = [1, 1]} : vector<2x128xf32> to vector<2x32xf32>
    %58 = arith.negf %57 : vector<2x32xf32>
    %59 = math.exp %58 : vector<2x32xf32>
    %cst_25 = arith.constant 1.000000e+00 : f32
    %60 = vector.broadcast %cst_25 : f32 to vector<2x32xf32>
    %61 = arith.addf %60, %59 : vector<2x32xf32>
    %62 = arith.divf %60, %61 : vector<2x32xf32>
    %63 = vector.extract_strided_slice %50 {offsets = [0, 64], sizes = [2, 32], strides = [1, 1]} : vector<2x128xf32> to vector<2x32xf32>
    %64 = math.tanh %63 : vector<2x32xf32>
    %65 = vector.extract_strided_slice %50 {offsets = [0, 96], sizes = [2, 32], strides = [1, 1]} : vector<2x128xf32> to vector<2x32xf32>
    %66 = arith.negf %65 : vector<2x32xf32>
    %67 = math.exp %66 : vector<2x32xf32>
    %cst_26 = arith.constant 1.000000e+00 : f32
    %68 = vector.broadcast %cst_26 : f32 to vector<2x32xf32>
    %69 = arith.addf %68, %67 : vector<2x32xf32>
    %70 = arith.divf %68, %69 : vector<2x32xf32>
    %71 = arith.mulf %62, %40 : vector<2x32xf32>
    %72 = arith.mulf %56, %64 : vector<2x32xf32>
    %73 = arith.addf %71, %72 : vector<2x32xf32>
    %74 = math.tanh %73 : vector<2x32xf32>
    %75 = arith.mulf %70, %74 : vector<2x32xf32>
    %76 = arith.index_cast %46 : i32 to index
    %c0_27 = arith.constant 0 : index
    %77 = vector.load %arg15[%76, %c0_27] : memref<16x32xf32, #tpu.memory_space<vmem>>, vector<2x32xf32>
    tpu.vector_store %arg15[%76, %c0_27], %75 {strides = array<i32>} : memref<16x32xf32, #tpu.memory_space<vmem>>, vector<2x32xf32>,
    %c2_i32_28 = arith.constant 2 : i32
    %c2_i32_29 = arith.constant 2 : i32
    %78 = arith.muli %c2_i32_28, %c2_i32_29 : i32
    %79 = tpu.assume_multiple %78, 2 : i32
    %80 = arith.index_cast %79 : i32 to index
    %c0_30 = arith.constant 0 : index
    %81 = vector.load %arg14[%80, %c0_30] : memref<16x128xf32, #tpu.memory_space<vmem>>, vector<2x128xf32>
    %cst_31 = arith.constant dense<0.000000e+00> : vector<2x128xf32>
    %82 = tpu.matmul %75, %7, %cst_31 {dimension_numbers = #tpu.dot_dimension_numbers<[1], [0], [0], [1], [0, 0, 1, 1], [], []>} : vector<2x32xf32>, vector<32x128xf32>, vector<2x128xf32> -> vector<2x128xf32>
    %83 = arith.addf %81, %82 : vector<2x128xf32>
    %84 = vector.extract_strided_slice %83 {offsets = [0, 0], sizes = [2, 32], strides = [1, 1]} : vector<2x128xf32> to vector<2x32xf32>
    %85 = arith.negf %84 : vector<2x32xf32>
    %86 = math.exp %85 : vector<2x32xf32>
    %cst_32 = arith.constant 1.000000e+00 : f32
    %87 = vector.broadcast %cst_32 : f32 to vector<2x32xf32>
    %88 = arith.addf %87, %86 : vector<2x32xf32>
    %89 = arith.divf %87, %88 : vector<2x32xf32>
    %90 = vector.extract_strided_slice %83 {offsets = [0, 32], sizes = [2, 32], strides = [1, 1]} : vector<2x128xf32> to vector<2x32xf32>
    %91 = arith.negf %90 : vector<2x32xf32>
    %92 = math.exp %91 : vector<2x32xf32>
    %cst_33 = arith.constant 1.000000e+00 : f32
    %93 = vector.broadcast %cst_33 : f32 to vector<2x32xf32>
    %94 = arith.addf %93, %92 : vector<2x32xf32>
    %95 = arith.divf %93, %94 : vector<2x32xf32>
    %96 = vector.extract_strided_slice %83 {offsets = [0, 64], sizes = [2, 32], strides = [1, 1]} : vector<2x128xf32> to vector<2x32xf32>
    %97 = math.tanh %96 : vector<2x32xf32>
    %98 = vector.extract_strided_slice %83 {offsets = [0, 96], sizes = [2, 32], strides = [1, 1]} : vector<2x128xf32> to vector<2x32xf32>
    %99 = arith.negf %98 : vector<2x32xf32>
    %100 = math.exp %99 : vector<2x32xf32>
    %cst_34 = arith.constant 1.000000e+00 : f32
    %101 = vector.broadcast %cst_34 : f32 to vector<2x32xf32>
    %102 = arith.addf %101, %100 : vector<2x32xf32>
    %103 = arith.divf %101, %102 : vector<2x32xf32>
    %104 = arith.mulf %95, %73 : vector<2x32xf32>
    %105 = arith.mulf %89, %97 : vector<2x32xf32>
    %106 = arith.addf %104, %105 : vector<2x32xf32>
    %107 = math.tanh %106 : vector<2x32xf32>
    %108 = arith.mulf %103, %107 : vector<2x32xf32>
    %109 = arith.index_cast %79 : i32 to index
    %c0_35 = arith.constant 0 : index
    %110 = vector.load %arg15[%109, %c0_35] : memref<16x32xf32, #tpu.memory_space<vmem>>, vector<2x32xf32>
    tpu.vector_store %arg15[%109, %c0_35], %108 {strides = array<i32>} : memref<16x32xf32, #tpu.memory_space<vmem>>, vector<2x32xf32>,
    %c3_i32 = arith.constant 3 : i32
    %c2_i32_36 = arith.constant 2 : i32
    %111 = arith.muli %c3_i32, %c2_i32_36 : i32
    %112 = tpu.assume_multiple %111, 2 : i32
    %113 = arith.index_cast %112 : i32 to index
    %c0_37 = arith.constant 0 : index
    %114 = vector.load %arg14[%113, %c0_37] : memref<16x128xf32, #tpu.memory_space<vmem>>, vector<2x128xf32>
    %cst_38 = arith.constant dense<0.000000e+00> : vector<2x128xf32>
    %115 = tpu.matmul %108, %7, %cst_38 {dimension_numbers = #tpu.dot_dimension_numbers<[1], [0], [0], [1], [0, 0, 1, 1], [], []>} : vector<2x32xf32>, vector<32x128xf32>, vector<2x128xf32> -> vector<2x128xf32>
    %116 = arith.addf %114, %115 : vector<2x128xf32>
    %117 = vector.extract_strided_slice %116 {offsets = [0, 0], sizes = [2, 32], strides = [1, 1]} : vector<2x128xf32> to vector<2x32xf32>
    %118 = arith.negf %117 : vector<2x32xf32>
    %119 = math.exp %118 : vector<2x32xf32>
    %cst_39 = arith.constant 1.000000e+00 : f32
    %120 = vector.broadcast %cst_39 : f32 to vector<2x32xf32>
    %121 = arith.addf %120, %119 : vector<2x32xf32>
    %122 = arith.divf %120, %121 : vector<2x32xf32>
    %123 = vector.extract_strided_slice %116 {offsets = [0, 32], sizes = [2, 32], strides = [1, 1]} : vector<2x128xf32> to vector<2x32xf32>
    %124 = arith.negf %123 : vector<2x32xf32>
    %125 = math.exp %124 : vector<2x32xf32>
    %cst_40 = arith.constant 1.000000e+00 : f32
    %126 = vector.broadcast %cst_40 : f32 to vector<2x32xf32>
    %127 = arith.addf %126, %125 : vector<2x32xf32>
    %128 = arith.divf %126, %127 : vector<2x32xf32>
    %129 = vector.extract_strided_slice %116 {offsets = [0, 64], sizes = [2, 32], strides = [1, 1]} : vector<2x128xf32> to vector<2x32xf32>
    %130 = math.tanh %129 : vector<2x32xf32>
    %131 = vector.extract_strided_slice %116 {offsets = [0, 96], sizes = [2, 32], strides = [1, 1]} : vector<2x128xf32> to vector<2x32xf32>
    %132 = arith.negf %131 : vector<2x32xf32>
    %133 = math.exp %132 : vector<2x32xf32>
    %cst_41 = arith.constant 1.000000e+00 : f32
    %134 = vector.broadcast %cst_41 : f32 to vector<2x32xf32>
    %135 = arith.addf %134, %133 : vector<2x32xf32>
    %136 = arith.divf %134, %135 : vector<2x32xf32>
    %137 = arith.mulf %128, %106 : vector<2x32xf32>
    %138 = arith.mulf %122, %130 : vector<2x32xf32>
    %139 = arith.addf %137, %138 : vector<2x32xf32>
    %140 = math.tanh %139 : vector<2x32xf32>
    %141 = arith.mulf %136, %140 : vector<2x32xf32>
    %142 = arith.index_cast %112 : i32 to index
    %c0_42 = arith.constant 0 : index
    %143 = vector.load %arg15[%142, %c0_42] : memref<16x32xf32, #tpu.memory_space<vmem>>, vector<2x32xf32>
    tpu.vector_store %arg15[%142, %c0_42], %141 {strides = array<i32>} : memref<16x32xf32, #tpu.memory_space<vmem>>, vector<2x32xf32>,
    %c4_i32 = arith.constant 4 : i32
    %c2_i32_43 = arith.constant 2 : i32
    %144 = arith.muli %c4_i32, %c2_i32_43 : i32
    %145 = tpu.assume_multiple %144, 2 : i32
    %146 = arith.index_cast %145 : i32 to index
    %c0_44 = arith.constant 0 : index
    %147 = vector.load %arg14[%146, %c0_44] : memref<16x128xf32, #tpu.memory_space<vmem>>, vector<2x128xf32>
    %cst_45 = arith.constant dense<0.000000e+00> : vector<2x128xf32>
    %148 = tpu.matmul %141, %7, %cst_45 {dimension_numbers = #tpu.dot_dimension_numbers<[1], [0], [0], [1], [0, 0, 1, 1], [], []>} : vector<2x32xf32>, vector<32x128xf32>, vector<2x128xf32> -> vector<2x128xf32>
    %149 = arith.addf %147, %148 : vector<2x128xf32>
    %150 = vector.extract_strided_slice %149 {offsets = [0, 0], sizes = [2, 32], strides = [1, 1]} : vector<2x128xf32> to vector<2x32xf32>
    %151 = arith.negf %150 : vector<2x32xf32>
    %152 = math.exp %151 : vector<2x32xf32>
    %cst_46 = arith.constant 1.000000e+00 : f32
    %153 = vector.broadcast %cst_46 : f32 to vector<2x32xf32>
    %154 = arith.addf %153, %152 : vector<2x32xf32>
    %155 = arith.divf %153, %154 : vector<2x32xf32>
    %156 = vector.extract_strided_slice %149 {offsets = [0, 32], sizes = [2, 32], strides = [1, 1]} : vector<2x128xf32> to vector<2x32xf32>
    %157 = arith.negf %156 : vector<2x32xf32>
    %158 = math.exp %157 : vector<2x32xf32>
    %cst_47 = arith.constant 1.000000e+00 : f32
    %159 = vector.broadcast %cst_47 : f32 to vector<2x32xf32>
    %160 = arith.addf %159, %158 : vector<2x32xf32>
    %161 = arith.divf %159, %160 : vector<2x32xf32>
    %162 = vector.extract_strided_slice %149 {offsets = [0, 64], sizes = [2, 32], strides = [1, 1]} : vector<2x128xf32> to vector<2x32xf32>
    %163 = math.tanh %162 : vector<2x32xf32>
    %164 = vector.extract_strided_slice %149 {offsets = [0, 96], sizes = [2, 32], strides = [1, 1]} : vector<2x128xf32> to vector<2x32xf32>
    %165 = arith.negf %164 : vector<2x32xf32>
    %166 = math.exp %165 : vector<2x32xf32>
    %cst_48 = arith.constant 1.000000e+00 : f32
    %167 = vector.broadcast %cst_48 : f32 to vector<2x32xf32>
    %168 = arith.addf %167, %166 : vector<2x32xf32>
    %169 = arith.divf %167, %168 : vector<2x32xf32>
    %170 = arith.mulf %161, %139 : vector<2x32xf32>
    %171 = arith.mulf %155, %163 : vector<2x32xf32>
    %172 = arith.addf %170, %171 : vector<2x32xf32>
    %173 = math.tanh %172 : vector<2x32xf32>
    %174 = arith.mulf %169, %173 : vector<2x32xf32>
    %175 = arith.index_cast %145 : i32 to index
    %c0_49 = arith.constant 0 : index
    %176 = vector.load %arg15[%175, %c0_49] : memref<16x32xf32, #tpu.memory_space<vmem>>, vector<2x32xf32>
    tpu.vector_store %arg15[%175, %c0_49], %174 {strides = array<i32>} : memref<16x32xf32, #tpu.memory_space<vmem>>, vector<2x32xf32>,
    %c5_i32 = arith.constant 5 : i32
    %c2_i32_50 = arith.constant 2 : i32
    %177 = arith.muli %c5_i32, %c2_i32_50 : i32
    %178 = tpu.assume_multiple %177, 2 : i32
    %179 = arith.index_cast %178 : i32 to index
    %c0_51 = arith.constant 0 : index
    %180 = vector.load %arg14[%179, %c0_51] : memref<16x128xf32, #tpu.memory_space<vmem>>, vector<2x128xf32>
    %cst_52 = arith.constant dense<0.000000e+00> : vector<2x128xf32>
    %181 = tpu.matmul %174, %7, %cst_52 {dimension_numbers = #tpu.dot_dimension_numbers<[1], [0], [0], [1], [0, 0, 1, 1], [], []>} : vector<2x32xf32>, vector<32x128xf32>, vector<2x128xf32> -> vector<2x128xf32>
    %182 = arith.addf %180, %181 : vector<2x128xf32>
    %183 = vector.extract_strided_slice %182 {offsets = [0, 0], sizes = [2, 32], strides = [1, 1]} : vector<2x128xf32> to vector<2x32xf32>
    %184 = arith.negf %183 : vector<2x32xf32>
    %185 = math.exp %184 : vector<2x32xf32>
    %cst_53 = arith.constant 1.000000e+00 : f32
    %186 = vector.broadcast %cst_53 : f32 to vector<2x32xf32>
    %187 = arith.addf %186, %185 : vector<2x32xf32>
    %188 = arith.divf %186, %187 : vector<2x32xf32>
    %189 = vector.extract_strided_slice %182 {offsets = [0, 32], sizes = [2, 32], strides = [1, 1]} : vector<2x128xf32> to vector<2x32xf32>
    %190 = arith.negf %189 : vector<2x32xf32>
    %191 = math.exp %190 : vector<2x32xf32>
    %cst_54 = arith.constant 1.000000e+00 : f32
    %192 = vector.broadcast %cst_54 : f32 to vector<2x32xf32>
    %193 = arith.addf %192, %191 : vector<2x32xf32>
    %194 = arith.divf %192, %193 : vector<2x32xf32>
    %195 = vector.extract_strided_slice %182 {offsets = [0, 64], sizes = [2, 32], strides = [1, 1]} : vector<2x128xf32> to vector<2x32xf32>
    %196 = math.tanh %195 : vector<2x32xf32>
    %197 = vector.extract_strided_slice %182 {offsets = [0, 96], sizes = [2, 32], strides = [1, 1]} : vector<2x128xf32> to vector<2x32xf32>
    %198 = arith.negf %197 : vector<2x32xf32>
    %199 = math.exp %198 : vector<2x32xf32>
    %cst_55 = arith.constant 1.000000e+00 : f32
    %200 = vector.broadcast %cst_55 : f32 to vector<2x32xf32>
    %201 = arith.addf %200, %199 : vector<2x32xf32>
    %202 = arith.divf %200, %201 : vector<2x32xf32>
    %203 = arith.mulf %194, %172 : vector<2x32xf32>
    %204 = arith.mulf %188, %196 : vector<2x32xf32>
    %205 = arith.addf %203, %204 : vector<2x32xf32>
    %206 = math.tanh %205 : vector<2x32xf32>
    %207 = arith.mulf %202, %206 : vector<2x32xf32>
    %208 = arith.index_cast %178 : i32 to index
    %c0_56 = arith.constant 0 : index
    %209 = vector.load %arg15[%208, %c0_56] : memref<16x32xf32, #tpu.memory_space<vmem>>, vector<2x32xf32>
    tpu.vector_store %arg15[%208, %c0_56], %207 {strides = array<i32>} : memref<16x32xf32, #tpu.memory_space<vmem>>, vector<2x32xf32>,
    %c6_i32 = arith.constant 6 : i32
    %c2_i32_57 = arith.constant 2 : i32
    %210 = arith.muli %c6_i32, %c2_i32_57 : i32
    %211 = tpu.assume_multiple %210, 2 : i32
    %212 = arith.index_cast %211 : i32 to index
    %c0_58 = arith.constant 0 : index
    %213 = vector.load %arg14[%212, %c0_58] : memref<16x128xf32, #tpu.memory_space<vmem>>, vector<2x128xf32>
    %cst_59 = arith.constant dense<0.000000e+00> : vector<2x128xf32>
    %214 = tpu.matmul %207, %7, %cst_59 {dimension_numbers = #tpu.dot_dimension_numbers<[1], [0], [0], [1], [0, 0, 1, 1], [], []>} : vector<2x32xf32>, vector<32x128xf32>, vector<2x128xf32> -> vector<2x128xf32>
    %215 = arith.addf %213, %214 : vector<2x128xf32>
    %216 = vector.extract_strided_slice %215 {offsets = [0, 0], sizes = [2, 32], strides = [1, 1]} : vector<2x128xf32> to vector<2x32xf32>
    %217 = arith.negf %216 : vector<2x32xf32>
    %218 = math.exp %217 : vector<2x32xf32>
    %cst_60 = arith.constant 1.000000e+00 : f32
    %219 = vector.broadcast %cst_60 : f32 to vector<2x32xf32>
    %220 = arith.addf %219, %218 : vector<2x32xf32>
    %221 = arith.divf %219, %220 : vector<2x32xf32>
    %222 = vector.extract_strided_slice %215 {offsets = [0, 32], sizes = [2, 32], strides = [1, 1]} : vector<2x128xf32> to vector<2x32xf32>
    %223 = arith.negf %222 : vector<2x32xf32>
    %224 = math.exp %223 : vector<2x32xf32>
    %cst_61 = arith.constant 1.000000e+00 : f32
    %225 = vector.broadcast %cst_61 : f32 to vector<2x32xf32>
    %226 = arith.addf %225, %224 : vector<2x32xf32>
    %227 = arith.divf %225, %226 : vector<2x32xf32>
    %228 = vector.extract_strided_slice %215 {offsets = [0, 64], sizes = [2, 32], strides = [1, 1]} : vector<2x128xf32> to vector<2x32xf32>
    %229 = math.tanh %228 : vector<2x32xf32>
    %230 = vector.extract_strided_slice %215 {offsets = [0, 96], sizes = [2, 32], strides = [1, 1]} : vector<2x128xf32> to vector<2x32xf32>
    %231 = arith.negf %230 : vector<2x32xf32>
    %232 = math.exp %231 : vector<2x32xf32>
    %cst_62 = arith.constant 1.000000e+00 : f32
    %233 = vector.broadcast %cst_62 : f32 to vector<2x32xf32>
    %234 = arith.addf %233, %232 : vector<2x32xf32>
    %235 = arith.divf %233, %234 : vector<2x32xf32>
    %236 = arith.mulf %227, %205 : vector<2x32xf32>
    %237 = arith.mulf %221, %229 : vector<2x32xf32>
    %238 = arith.addf %236, %237 : vector<2x32xf32>
    %239 = math.tanh %238 : vector<2x32xf32>
    %240 = arith.mulf %235, %239 : vector<2x32xf32>
    %241 = arith.index_cast %211 : i32 to index
    %c0_63 = arith.constant 0 : index
    %242 = vector.load %arg15[%241, %c0_63] : memref<16x32xf32, #tpu.memory_space<vmem>>, vector<2x32xf32>
    tpu.vector_store %arg15[%241, %c0_63], %240 {strides = array<i32>} : memref<16x32xf32, #tpu.memory_space<vmem>>, vector<2x32xf32>,
    %c7_i32 = arith.constant 7 : i32
    %c2_i32_64 = arith.constant 2 : i32
    %243 = arith.muli %c7_i32, %c2_i32_64 : i32
    %244 = tpu.assume_multiple %243, 2 : i32
    %245 = arith.index_cast %244 : i32 to index
    %c0_65 = arith.constant 0 : index
    %246 = vector.load %arg14[%245, %c0_65] : memref<16x128xf32, #tpu.memory_space<vmem>>, vector<2x128xf32>
    %cst_66 = arith.constant dense<0.000000e+00> : vector<2x128xf32>
    %247 = tpu.matmul %240, %7, %cst_66 {dimension_numbers = #tpu.dot_dimension_numbers<[1], [0], [0], [1], [0, 0, 1, 1], [], []>} : vector<2x32xf32>, vector<32x128xf32>, vector<2x128xf32> -> vector<2x128xf32>
    %248 = arith.addf %246, %247 : vector<2x128xf32>
    %249 = vector.extract_strided_slice %248 {offsets = [0, 0], sizes = [2, 32], strides = [1, 1]} : vector<2x128xf32> to vector<2x32xf32>
    %250 = arith.negf %249 : vector<2x32xf32>
    %251 = math.exp %250 : vector<2x32xf32>
    %cst_67 = arith.constant 1.000000e+00 : f32
    %252 = vector.broadcast %cst_67 : f32 to vector<2x32xf32>
    %253 = arith.addf %252, %251 : vector<2x32xf32>
    %254 = arith.divf %252, %253 : vector<2x32xf32>
    %255 = vector.extract_strided_slice %248 {offsets = [0, 32], sizes = [2, 32], strides = [1, 1]} : vector<2x128xf32> to vector<2x32xf32>
    %256 = arith.negf %255 : vector<2x32xf32>
    %257 = math.exp %256 : vector<2x32xf32>
    %cst_68 = arith.constant 1.000000e+00 : f32
    %258 = vector.broadcast %cst_68 : f32 to vector<2x32xf32>
    %259 = arith.addf %258, %257 : vector<2x32xf32>
    %260 = arith.divf %258, %259 : vector<2x32xf32>
    %261 = vector.extract_strided_slice %248 {offsets = [0, 64], sizes = [2, 32], strides = [1, 1]} : vector<2x128xf32> to vector<2x32xf32>
    %262 = math.tanh %261 : vector<2x32xf32>
    %263 = vector.extract_strided_slice %248 {offsets = [0, 96], sizes = [2, 32], strides = [1, 1]} : vector<2x128xf32> to vector<2x32xf32>
    %264 = arith.negf %263 : vector<2x32xf32>
    %265 = math.exp %264 : vector<2x32xf32>
    %cst_69 = arith.constant 1.000000e+00 : f32
    %266 = vector.broadcast %cst_69 : f32 to vector<2x32xf32>
    %267 = arith.addf %266, %265 : vector<2x32xf32>
    %268 = arith.divf %266, %267 : vector<2x32xf32>
    %269 = arith.mulf %260, %238 : vector<2x32xf32>
    %270 = arith.mulf %254, %262 : vector<2x32xf32>
    %271 = arith.addf %269, %270 : vector<2x32xf32>
    %272 = math.tanh %271 : vector<2x32xf32>
    %273 = arith.mulf %268, %272 : vector<2x32xf32>
    %274 = arith.index_cast %244 : i32 to index
    %c0_70 = arith.constant 0 : index
    %275 = vector.load %arg15[%274, %c0_70] : memref<16x32xf32, #tpu.memory_space<vmem>>, vector<2x32xf32>
    tpu.vector_store %arg15[%274, %c0_70], %273 {strides = array<i32>} : memref<16x32xf32, #tpu.memory_space<vmem>>, vector<2x32xf32>,
    %c8_i32 = arith.constant 8 : i32
    %c0_71 = arith.constant 0 : index
    %c0_72 = arith.constant 0 : index
    %c0_73 = arith.constant 0 : index
    %276 = vector.load %arg12[%c0_71, %c0_72, %c0_73] : memref<2x2x32xf32, #tpu.memory_space<vmem>>, vector<1x2x32xf32>
    %277 = vector.shape_cast %276 : vector<1x2x32xf32> to vector<2x32xf32>
    %278 = vector.shape_cast %273 : vector<2x32xf32> to vector<1x2x32xf32>
    tpu.vector_store %arg12[%c0_71, %c0_72, %c0_73], %278 {strides = array<i32>} : memref<2x2x32xf32, #tpu.memory_space<vmem>>, vector<1x2x32xf32>,
    %c0_74 = arith.constant 0 : index
    %c0_75 = arith.constant 0 : index
    %c0_76 = arith.constant 0 : index
    %279 = vector.load %arg13[%c0_74, %c0_75, %c0_76] : memref<2x2x32xf32, #tpu.memory_space<vmem>>, vector<1x2x32xf32>
    %280 = vector.shape_cast %279 : vector<1x2x32xf32> to vector<2x32xf32>
    %281 = vector.shape_cast %271 : vector<2x32xf32> to vector<1x2x32xf32>
    tpu.vector_store %arg13[%c0_74, %c0_75, %c0_76], %281 {strides = array<i32>} : memref<2x2x32xf32, #tpu.memory_space<vmem>>, vector<1x2x32xf32>,
    %c0_77 = arith.constant 0 : index
    %c0_78 = arith.constant 0 : index
    %282 = vector.load %arg15[%c0_77, %c0_78] : memref<16x32xf32, #tpu.memory_space<vmem>>, vector<16x32xf32>
    %c0_79 = arith.constant 0 : index
    %c0_80 = arith.constant 0 : index
    %283 = vector.load %arg4[%c0_79, %c0_80] : memref<32x128xf32, #tpu.memory_space<vmem>>, vector<32x128xf32>
    %cst_81 = arith.constant dense<0.000000e+00> : vector<16x128xf32>
    %284 = tpu.matmul %282, %283, %cst_81 {dimension_numbers = #tpu.dot_dimension_numbers<[1], [0], [0], [1], [0, 0, 1, 1], [], []>} : vector<16x32xf32>, vector<32x128xf32>, vector<16x128xf32> -> vector<16x128xf32>
    %c0_82 = arith.constant 0 : index
    %c0_83 = arith.constant 0 : index
    %285 = vector.load %arg6[%c0_82, %c0_83] : memref<1x128xf32, #tpu.memory_space<vmem>>, vector<1x128xf32>
    %286 = vector.broadcast %285 : vector<1x128xf32> to vector<16x128xf32>
    %287 = arith.addf %284, %286 : vector<16x128xf32>
    %c0_84 = arith.constant 0 : index
    %c0_85 = arith.constant 0 : index
    %288 = vector.load %arg14[%c0_84, %c0_85] : memref<16x128xf32, #tpu.memory_space<vmem>>, vector<16x128xf32>
    tpu.vector_store %arg14[%c0_84, %c0_85], %287 {strides = array<i32>} : memref<16x128xf32, #tpu.memory_space<vmem>>, vector<16x128xf32>,
    %c0_86 = arith.constant 0 : index
    %c0_87 = arith.constant 0 : index
    %289 = vector.load %arg5[%c0_86, %c0_87] : memref<32x128xf32, #tpu.memory_space<vmem>>, vector<32x128xf32>
    %c1 = arith.constant 1 : index
    %c0_88 = arith.constant 0 : index
    %c0_89 = arith.constant 0 : index
    %290 = vector.load %arg9[%c1, %c0_88, %c0_89] : memref<2x2x32xf32, #tpu.memory_space<vmem>>, vector<1x2x32xf32>
    %291 = vector.shape_cast %290 : vector<1x2x32xf32> to vector<2x32xf32>
    %c1_90 = arith.constant 1 : index
    %c0_91 = arith.constant 0 : index
    %c0_92 = arith.constant 0 : index
    %292 = vector.load %arg10[%c1_90, %c0_91, %c0_92] : memref<2x2x32xf32, #tpu.memory_space<vmem>>, vector<1x2x32xf32>
    %293 = vector.shape_cast %292 : vector<1x2x32xf32> to vector<2x32xf32>
    %c0_i32_93 = arith.constant 0 : i32
    %c2_i32_94 = arith.constant 2 : i32
    %294 = arith.muli %c0_i32_93, %c2_i32_94 : i32
    %295 = tpu.assume_multiple %294, 2 : i32
    %296 = arith.index_cast %295 : i32 to index
    %c0_95 = arith.constant 0 : index
    %297 = vector.load %arg14[%296, %c0_95] : memref<16x128xf32, #tpu.memory_space<vmem>>, vector<2x128xf32>
    %cst_96 = arith.constant dense<0.000000e+00> : vector<2x128xf32>
    %298 = tpu.matmul %291, %289, %cst_96 {dimension_numbers = #tpu.dot_dimension_numbers<[1], [0], [0], [1], [0, 0, 1, 1], [], []>} : vector<2x32xf32>, vector<32x128xf32>, vector<2x128xf32> -> vector<2x128xf32>
    %299 = arith.addf %297, %298 : vector<2x128xf32>
    %300 = vector.extract_strided_slice %299 {offsets = [0, 0], sizes = [2, 32], strides = [1, 1]} : vector<2x128xf32> to vector<2x32xf32>
    %301 = arith.negf %300 : vector<2x32xf32>
    %302 = math.exp %301 : vector<2x32xf32>
    %cst_97 = arith.constant 1.000000e+00 : f32
    %303 = vector.broadcast %cst_97 : f32 to vector<2x32xf32>
    %304 = arith.addf %303, %302 : vector<2x32xf32>
    %305 = arith.divf %303, %304 : vector<2x32xf32>
    %306 = vector.extract_strided_slice %299 {offsets = [0, 32], sizes = [2, 32], strides = [1, 1]} : vector<2x128xf32> to vector<2x32xf32>
    %307 = arith.negf %306 : vector<2x32xf32>
    %308 = math.exp %307 : vector<2x32xf32>
    %cst_98 = arith.constant 1.000000e+00 : f32
    %309 = vector.broadcast %cst_98 : f32 to vector<2x32xf32>
    %310 = arith.addf %309, %308 : vector<2x32xf32>
    %311 = arith.divf %309, %310 : vector<2x32xf32>
    %312 = vector.extract_strided_slice %299 {offsets = [0, 64], sizes = [2, 32], strides = [1, 1]} : vector<2x128xf32> to vector<2x32xf32>
    %313 = math.tanh %312 : vector<2x32xf32>
    %314 = vector.extract_strided_slice %299 {offsets = [0, 96], sizes = [2, 32], strides = [1, 1]} : vector<2x128xf32> to vector<2x32xf32>
    %315 = arith.negf %314 : vector<2x32xf32>
    %316 = math.exp %315 : vector<2x32xf32>
    %cst_99 = arith.constant 1.000000e+00 : f32
    %317 = vector.broadcast %cst_99 : f32 to vector<2x32xf32>
    %318 = arith.addf %317, %316 : vector<2x32xf32>
    %319 = arith.divf %317, %318 : vector<2x32xf32>
    %320 = arith.mulf %311, %293 : vector<2x32xf32>
    %321 = arith.mulf %305, %313 : vector<2x32xf32>
    %322 = arith.addf %320, %321 : vector<2x32xf32>
    %323 = math.tanh %322 : vector<2x32xf32>
    %324 = arith.mulf %319, %323 : vector<2x32xf32>
    %325 = arith.index_cast %295 : i32 to index
    %c0_100 = arith.constant 0 : index
    %326 = vector.load %arg15[%325, %c0_100] : memref<16x32xf32, #tpu.memory_space<vmem>>, vector<2x32xf32>
    tpu.vector_store %arg15[%325, %c0_100], %324 {strides = array<i32>} : memref<16x32xf32, #tpu.memory_space<vmem>>, vector<2x32xf32>,
    %c1_i32_101 = arith.constant 1 : i32
    %c2_i32_102 = arith.constant 2 : i32
    %327 = arith.muli %c1_i32_101, %c2_i32_102 : i32
    %328 = tpu.assume_multiple %327, 2 : i32
    %329 = arith.index_cast %328 : i32 to index
    %c0_103 = arith.constant 0 : index
    %330 = vector.load %arg14[%329, %c0_103] : memref<16x128xf32, #tpu.memory_space<vmem>>, vector<2x128xf32>
    %cst_104 = arith.constant dense<0.000000e+00> : vector<2x128xf32>
    %331 = tpu.matmul %324, %289, %cst_104 {dimension_numbers = #tpu.dot_dimension_numbers<[1], [0], [0], [1], [0, 0, 1, 1], [], []>} : vector<2x32xf32>, vector<32x128xf32>, vector<2x128xf32> -> vector<2x128xf32>
    %332 = arith.addf %330, %331 : vector<2x128xf32>
    %333 = vector.extract_strided_slice %332 {offsets = [0, 0], sizes = [2, 32], strides = [1, 1]} : vector<2x128xf32> to vector<2x32xf32>
    %334 = arith.negf %333 : vector<2x32xf32>
    %335 = math.exp %334 : vector<2x32xf32>
    %cst_105 = arith.constant 1.000000e+00 : f32
    %336 = vector.broadcast %cst_105 : f32 to vector<2x32xf32>
    %337 = arith.addf %336, %335 : vector<2x32xf32>
    %338 = arith.divf %336, %337 : vector<2x32xf32>
    %339 = vector.extract_strided_slice %332 {offsets = [0, 32], sizes = [2, 32], strides = [1, 1]} : vector<2x128xf32> to vector<2x32xf32>
    %340 = arith.negf %339 : vector<2x32xf32>
    %341 = math.exp %340 : vector<2x32xf32>
    %cst_106 = arith.constant 1.000000e+00 : f32
    %342 = vector.broadcast %cst_106 : f32 to vector<2x32xf32>
    %343 = arith.addf %342, %341 : vector<2x32xf32>
    %344 = arith.divf %342, %343 : vector<2x32xf32>
    %345 = vector.extract_strided_slice %332 {offsets = [0, 64], sizes = [2, 32], strides = [1, 1]} : vector<2x128xf32> to vector<2x32xf32>
    %346 = math.tanh %345 : vector<2x32xf32>
    %347 = vector.extract_strided_slice %332 {offsets = [0, 96], sizes = [2, 32], strides = [1, 1]} : vector<2x128xf32> to vector<2x32xf32>
    %348 = arith.negf %347 : vector<2x32xf32>
    %349 = math.exp %348 : vector<2x32xf32>
    %cst_107 = arith.constant 1.000000e+00 : f32
    %350 = vector.broadcast %cst_107 : f32 to vector<2x32xf32>
    %351 = arith.addf %350, %349 : vector<2x32xf32>
    %352 = arith.divf %350, %351 : vector<2x32xf32>
    %353 = arith.mulf %344, %322 : vector<2x32xf32>
    %354 = arith.mulf %338, %346 : vector<2x32xf32>
    %355 = arith.addf %353, %354 : vector<2x32xf32>
    %356 = math.tanh %355 : vector<2x32xf32>
    %357 = arith.mulf %352, %356 : vector<2x32xf32>
    %358 = arith.index_cast %328 : i32 to index
    %c0_108 = arith.constant 0 : index
    %359 = vector.load %arg15[%358, %c0_108] : memref<16x32xf32, #tpu.memory_space<vmem>>, vector<2x32xf32>
    tpu.vector_store %arg15[%358, %c0_108], %357 {strides = array<i32>} : memref<16x32xf32, #tpu.memory_space<vmem>>, vector<2x32xf32>,
    %c2_i32_109 = arith.constant 2 : i32
    %c2_i32_110 = arith.constant 2 : i32
    %360 = arith.muli %c2_i32_109, %c2_i32_110 : i32
    %361 = tpu.assume_multiple %360, 2 : i32
    %362 = arith.index_cast %361 : i32 to index
    %c0_111 = arith.constant 0 : index
    %363 = vector.load %arg14[%362, %c0_111] : memref<16x128xf32, #tpu.memory_space<vmem>>, vector<2x128xf32>
    %cst_112 = arith.constant dense<0.000000e+00> : vector<2x128xf32>
    %364 = tpu.matmul %357, %289, %cst_112 {dimension_numbers = #tpu.dot_dimension_numbers<[1], [0], [0], [1], [0, 0, 1, 1], [], []>} : vector<2x32xf32>, vector<32x128xf32>, vector<2x128xf32> -> vector<2x128xf32>
    %365 = arith.addf %363, %364 : vector<2x128xf32>
    %366 = vector.extract_strided_slice %365 {offsets = [0, 0], sizes = [2, 32], strides = [1, 1]} : vector<2x128xf32> to vector<2x32xf32>
    %367 = arith.negf %366 : vector<2x32xf32>
    %368 = math.exp %367 : vector<2x32xf32>
    %cst_113 = arith.constant 1.000000e+00 : f32
    %369 = vector.broadcast %cst_113 : f32 to vector<2x32xf32>
    %370 = arith.addf %369, %368 : vector<2x32xf32>
    %371 = arith.divf %369, %370 : vector<2x32xf32>
    %372 = vector.extract_strided_slice %365 {offsets = [0, 32], sizes = [2, 32], strides = [1, 1]} : vector<2x128xf32> to vector<2x32xf32>
    %373 = arith.negf %372 : vector<2x32xf32>
    %374 = math.exp %373 : vector<2x32xf32>
    %cst_114 = arith.constant 1.000000e+00 : f32
    %375 = vector.broadcast %cst_114 : f32 to vector<2x32xf32>
    %376 = arith.addf %375, %374 : vector<2x32xf32>
    %377 = arith.divf %375, %376 : vector<2x32xf32>
    %378 = vector.extract_strided_slice %365 {offsets = [0, 64], sizes = [2, 32], strides = [1, 1]} : vector<2x128xf32> to vector<2x32xf32>
    %379 = math.tanh %378 : vector<2x32xf32>
    %380 = vector.extract_strided_slice %365 {offsets = [0, 96], sizes = [2, 32], strides = [1, 1]} : vector<2x128xf32> to vector<2x32xf32>
    %381 = arith.negf %380 : vector<2x32xf32>
    %382 = math.exp %381 : vector<2x32xf32>
    %cst_115 = arith.constant 1.000000e+00 : f32
    %383 = vector.broadcast %cst_115 : f32 to vector<2x32xf32>
    %384 = arith.addf %383, %382 : vector<2x32xf32>
    %385 = arith.divf %383, %384 : vector<2x32xf32>
    %386 = arith.mulf %377, %355 : vector<2x32xf32>
    %387 = arith.mulf %371, %379 : vector<2x32xf32>
    %388 = arith.addf %386, %387 : vector<2x32xf32>
    %389 = math.tanh %388 : vector<2x32xf32>
    %390 = arith.mulf %385, %389 : vector<2x32xf32>
    %391 = arith.index_cast %361 : i32 to index
    %c0_116 = arith.constant 0 : index
    %392 = vector.load %arg15[%391, %c0_116] : memref<16x32xf32, #tpu.memory_space<vmem>>, vector<2x32xf32>
    tpu.vector_store %arg15[%391, %c0_116], %390 {strides = array<i32>} : memref<16x32xf32, #tpu.memory_space<vmem>>, vector<2x32xf32>,
    %c3_i32_117 = arith.constant 3 : i32
    %c2_i32_118 = arith.constant 2 : i32
    %393 = arith.muli %c3_i32_117, %c2_i32_118 : i32
    %394 = tpu.assume_multiple %393, 2 : i32
    %395 = arith.index_cast %394 : i32 to index
    %c0_119 = arith.constant 0 : index
    %396 = vector.load %arg14[%395, %c0_119] : memref<16x128xf32, #tpu.memory_space<vmem>>, vector<2x128xf32>
    %cst_120 = arith.constant dense<0.000000e+00> : vector<2x128xf32>
    %397 = tpu.matmul %390, %289, %cst_120 {dimension_numbers = #tpu.dot_dimension_numbers<[1], [0], [0], [1], [0, 0, 1, 1], [], []>} : vector<2x32xf32>, vector<32x128xf32>, vector<2x128xf32> -> vector<2x128xf32>
    %398 = arith.addf %396, %397 : vector<2x128xf32>
    %399 = vector.extract_strided_slice %398 {offsets = [0, 0], sizes = [2, 32], strides = [1, 1]} : vector<2x128xf32> to vector<2x32xf32>
    %400 = arith.negf %399 : vector<2x32xf32>
    %401 = math.exp %400 : vector<2x32xf32>
    %cst_121 = arith.constant 1.000000e+00 : f32
    %402 = vector.broadcast %cst_121 : f32 to vector<2x32xf32>
    %403 = arith.addf %402, %401 : vector<2x32xf32>
    %404 = arith.divf %402, %403 : vector<2x32xf32>
    %405 = vector.extract_strided_slice %398 {offsets = [0, 32], sizes = [2, 32], strides = [1, 1]} : vector<2x128xf32> to vector<2x32xf32>
    %406 = arith.negf %405 : vector<2x32xf32>
    %407 = math.exp %406 : vector<2x32xf32>
    %cst_122 = arith.constant 1.000000e+00 : f32
    %408 = vector.broadcast %cst_122 : f32 to vector<2x32xf32>
    %409 = arith.addf %408, %407 : vector<2x32xf32>
    %410 = arith.divf %408, %409 : vector<2x32xf32>
    %411 = vector.extract_strided_slice %398 {offsets = [0, 64], sizes = [2, 32], strides = [1, 1]} : vector<2x128xf32> to vector<2x32xf32>
    %412 = math.tanh %411 : vector<2x32xf32>
    %413 = vector.extract_strided_slice %398 {offsets = [0, 96], sizes = [2, 32], strides = [1, 1]} : vector<2x128xf32> to vector<2x32xf32>
    %414 = arith.negf %413 : vector<2x32xf32>
    %415 = math.exp %414 : vector<2x32xf32>
    %cst_123 = arith.constant 1.000000e+00 : f32
    %416 = vector.broadcast %cst_123 : f32 to vector<2x32xf32>
    %417 = arith.addf %416, %415 : vector<2x32xf32>
    %418 = arith.divf %416, %417 : vector<2x32xf32>
    %419 = arith.mulf %410, %388 : vector<2x32xf32>
    %420 = arith.mulf %404, %412 : vector<2x32xf32>
    %421 = arith.addf %419, %420 : vector<2x32xf32>
    %422 = math.tanh %421 : vector<2x32xf32>
    %423 = arith.mulf %418, %422 : vector<2x32xf32>
    %424 = arith.index_cast %394 : i32 to index
    %c0_124 = arith.constant 0 : index
    %425 = vector.load %arg15[%424, %c0_124] : memref<16x32xf32, #tpu.memory_space<vmem>>, vector<2x32xf32>
    tpu.vector_store %arg15[%424, %c0_124], %423 {strides = array<i32>} : memref<16x32xf32, #tpu.memory_space<vmem>>, vector<2x32xf32>,
    %c4_i32_125 = arith.constant 4 : i32
    %c2_i32_126 = arith.constant 2 : i32
    %426 = arith.muli %c4_i32_125, %c2_i32_126 : i32
    %427 = tpu.assume_multiple %426, 2 : i32
    %428 = arith.index_cast %427 : i32 to index
    %c0_127 = arith.constant 0 : index
    %429 = vector.load %arg14[%428, %c0_127] : memref<16x128xf32, #tpu.memory_space<vmem>>, vector<2x128xf32>
    %cst_128 = arith.constant dense<0.000000e+00> : vector<2x128xf32>
    %430 = tpu.matmul %423, %289, %cst_128 {dimension_numbers = #tpu.dot_dimension_numbers<[1], [0], [0], [1], [0, 0, 1, 1], [], []>} : vector<2x32xf32>, vector<32x128xf32>, vector<2x128xf32> -> vector<2x128xf32>
    %431 = arith.addf %429, %430 : vector<2x128xf32>
    %432 = vector.extract_strided_slice %431 {offsets = [0, 0], sizes = [2, 32], strides = [1, 1]} : vector<2x128xf32> to vector<2x32xf32>
    %433 = arith.negf %432 : vector<2x32xf32>
    %434 = math.exp %433 : vector<2x32xf32>
    %cst_129 = arith.constant 1.000000e+00 : f32
    %435 = vector.broadcast %cst_129 : f32 to vector<2x32xf32>
    %436 = arith.addf %435, %434 : vector<2x32xf32>
    %437 = arith.divf %435, %436 : vector<2x32xf32>
    %438 = vector.extract_strided_slice %431 {offsets = [0, 32], sizes = [2, 32], strides = [1, 1]} : vector<2x128xf32> to vector<2x32xf32>
    %439 = arith.negf %438 : vector<2x32xf32>
    %440 = math.exp %439 : vector<2x32xf32>
    %cst_130 = arith.constant 1.000000e+00 : f32
    %441 = vector.broadcast %cst_130 : f32 to vector<2x32xf32>
    %442 = arith.addf %441, %440 : vector<2x32xf32>
    %443 = arith.divf %441, %442 : vector<2x32xf32>
    %444 = vector.extract_strided_slice %431 {offsets = [0, 64], sizes = [2, 32], strides = [1, 1]} : vector<2x128xf32> to vector<2x32xf32>
    %445 = math.tanh %444 : vector<2x32xf32>
    %446 = vector.extract_strided_slice %431 {offsets = [0, 96], sizes = [2, 32], strides = [1, 1]} : vector<2x128xf32> to vector<2x32xf32>
    %447 = arith.negf %446 : vector<2x32xf32>
    %448 = math.exp %447 : vector<2x32xf32>
    %cst_131 = arith.constant 1.000000e+00 : f32
    %449 = vector.broadcast %cst_131 : f32 to vector<2x32xf32>
    %450 = arith.addf %449, %448 : vector<2x32xf32>
    %451 = arith.divf %449, %450 : vector<2x32xf32>
    %452 = arith.mulf %443, %421 : vector<2x32xf32>
    %453 = arith.mulf %437, %445 : vector<2x32xf32>
    %454 = arith.addf %452, %453 : vector<2x32xf32>
    %455 = math.tanh %454 : vector<2x32xf32>
    %456 = arith.mulf %451, %455 : vector<2x32xf32>
    %457 = arith.index_cast %427 : i32 to index
    %c0_132 = arith.constant 0 : index
    %458 = vector.load %arg15[%457, %c0_132] : memref<16x32xf32, #tpu.memory_space<vmem>>, vector<2x32xf32>
    tpu.vector_store %arg15[%457, %c0_132], %456 {strides = array<i32>} : memref<16x32xf32, #tpu.memory_space<vmem>>, vector<2x32xf32>,
    %c5_i32_133 = arith.constant 5 : i32
    %c2_i32_134 = arith.constant 2 : i32
    %459 = arith.muli %c5_i32_133, %c2_i32_134 : i32
    %460 = tpu.assume_multiple %459, 2 : i32
    %461 = arith.index_cast %460 : i32 to index
    %c0_135 = arith.constant 0 : index
    %462 = vector.load %arg14[%461, %c0_135] : memref<16x128xf32, #tpu.memory_space<vmem>>, vector<2x128xf32>
    %cst_136 = arith.constant dense<0.000000e+00> : vector<2x128xf32>
    %463 = tpu.matmul %456, %289, %cst_136 {dimension_numbers = #tpu.dot_dimension_numbers<[1], [0], [0], [1], [0, 0, 1, 1], [], []>} : vector<2x32xf32>, vector<32x128xf32>, vector<2x128xf32> -> vector<2x128xf32>
    %464 = arith.addf %462, %463 : vector<2x128xf32>
    %465 = vector.extract_strided_slice %464 {offsets = [0, 0], sizes = [2, 32], strides = [1, 1]} : vector<2x128xf32> to vector<2x32xf32>
    %466 = arith.negf %465 : vector<2x32xf32>
    %467 = math.exp %466 : vector<2x32xf32>
    %cst_137 = arith.constant 1.000000e+00 : f32
    %468 = vector.broadcast %cst_137 : f32 to vector<2x32xf32>
    %469 = arith.addf %468, %467 : vector<2x32xf32>
    %470 = arith.divf %468, %469 : vector<2x32xf32>
    %471 = vector.extract_strided_slice %464 {offsets = [0, 32], sizes = [2, 32], strides = [1, 1]} : vector<2x128xf32> to vector<2x32xf32>
    %472 = arith.negf %471 : vector<2x32xf32>
    %473 = math.exp %472 : vector<2x32xf32>
    %cst_138 = arith.constant 1.000000e+00 : f32
    %474 = vector.broadcast %cst_138 : f32 to vector<2x32xf32>
    %475 = arith.addf %474, %473 : vector<2x32xf32>
    %476 = arith.divf %474, %475 : vector<2x32xf32>
    %477 = vector.extract_strided_slice %464 {offsets = [0, 64], sizes = [2, 32], strides = [1, 1]} : vector<2x128xf32> to vector<2x32xf32>
    %478 = math.tanh %477 : vector<2x32xf32>
    %479 = vector.extract_strided_slice %464 {offsets = [0, 96], sizes = [2, 32], strides = [1, 1]} : vector<2x128xf32> to vector<2x32xf32>
    %480 = arith.negf %479 : vector<2x32xf32>
    %481 = math.exp %480 : vector<2x32xf32>
    %cst_139 = arith.constant 1.000000e+00 : f32
    %482 = vector.broadcast %cst_139 : f32 to vector<2x32xf32>
    %483 = arith.addf %482, %481 : vector<2x32xf32>
    %484 = arith.divf %482, %483 : vector<2x32xf32>
    %485 = arith.mulf %476, %454 : vector<2x32xf32>
    %486 = arith.mulf %470, %478 : vector<2x32xf32>
    %487 = arith.addf %485, %486 : vector<2x32xf32>
    %488 = math.tanh %487 : vector<2x32xf32>
    %489 = arith.mulf %484, %488 : vector<2x32xf32>
    %490 = arith.index_cast %460 : i32 to index
    %c0_140 = arith.constant 0 : index
    %491 = vector.load %arg15[%490, %c0_140] : memref<16x32xf32, #tpu.memory_space<vmem>>, vector<2x32xf32>
    tpu.vector_store %arg15[%490, %c0_140], %489 {strides = array<i32>} : memref<16x32xf32, #tpu.memory_space<vmem>>, vector<2x32xf32>,
    %c6_i32_141 = arith.constant 6 : i32
    %c2_i32_142 = arith.constant 2 : i32
    %492 = arith.muli %c6_i32_141, %c2_i32_142 : i32
    %493 = tpu.assume_multiple %492, 2 : i32
    %494 = arith.index_cast %493 : i32 to index
    %c0_143 = arith.constant 0 : index
    %495 = vector.load %arg14[%494, %c0_143] : memref<16x128xf32, #tpu.memory_space<vmem>>, vector<2x128xf32>
    %cst_144 = arith.constant dense<0.000000e+00> : vector<2x128xf32>
    %496 = tpu.matmul %489, %289, %cst_144 {dimension_numbers = #tpu.dot_dimension_numbers<[1], [0], [0], [1], [0, 0, 1, 1], [], []>} : vector<2x32xf32>, vector<32x128xf32>, vector<2x128xf32> -> vector<2x128xf32>
    %497 = arith.addf %495, %496 : vector<2x128xf32>
    %498 = vector.extract_strided_slice %497 {offsets = [0, 0], sizes = [2, 32], strides = [1, 1]} : vector<2x128xf32> to vector<2x32xf32>
    %499 = arith.negf %498 : vector<2x32xf32>
    %500 = math.exp %499 : vector<2x32xf32>
    %cst_145 = arith.constant 1.000000e+00 : f32
    %501 = vector.broadcast %cst_145 : f32 to vector<2x32xf32>
    %502 = arith.addf %501, %500 : vector<2x32xf32>
    %503 = arith.divf %501, %502 : vector<2x32xf32>
    %504 = vector.extract_strided_slice %497 {offsets = [0, 32], sizes = [2, 32], strides = [1, 1]} : vector<2x128xf32> to vector<2x32xf32>
    %505 = arith.negf %504 : vector<2x32xf32>
    %506 = math.exp %505 : vector<2x32xf32>
    %cst_146 = arith.constant 1.000000e+00 : f32
    %507 = vector.broadcast %cst_146 : f32 to vector<2x32xf32>
    %508 = arith.addf %507, %506 : vector<2x32xf32>
    %509 = arith.divf %507, %508 : vector<2x32xf32>
    %510 = vector.extract_strided_slice %497 {offsets = [0, 64], sizes = [2, 32], strides = [1, 1]} : vector<2x128xf32> to vector<2x32xf32>
    %511 = math.tanh %510 : vector<2x32xf32>
    %512 = vector.extract_strided_slice %497 {offsets = [0, 96], sizes = [2, 32], strides = [1, 1]} : vector<2x128xf32> to vector<2x32xf32>
    %513 = arith.negf %512 : vector<2x32xf32>
    %514 = math.exp %513 : vector<2x32xf32>
    %cst_147 = arith.constant 1.000000e+00 : f32
    %515 = vector.broadcast %cst_147 : f32 to vector<2x32xf32>
    %516 = arith.addf %515, %514 : vector<2x32xf32>
    %517 = arith.divf %515, %516 : vector<2x32xf32>
    %518 = arith.mulf %509, %487 : vector<2x32xf32>
    %519 = arith.mulf %503, %511 : vector<2x32xf32>
    %520 = arith.addf %518, %519 : vector<2x32xf32>
    %521 = math.tanh %520 : vector<2x32xf32>
    %522 = arith.mulf %517, %521 : vector<2x32xf32>
    %523 = arith.index_cast %493 : i32 to index
    %c0_148 = arith.constant 0 : index
    %524 = vector.load %arg15[%523, %c0_148] : memref<16x32xf32, #tpu.memory_space<vmem>>, vector<2x32xf32>
    tpu.vector_store %arg15[%523, %c0_148], %522 {strides = array<i32>} : memref<16x32xf32, #tpu.memory_space<vmem>>, vector<2x32xf32>,
    %c7_i32_149 = arith.constant 7 : i32
    %c2_i32_150 = arith.constant 2 : i32
    %525 = arith.muli %c7_i32_149, %c2_i32_150 : i32
    %526 = tpu.assume_multiple %525, 2 : i32
    %527 = arith.index_cast %526 : i32 to index
    %c0_151 = arith.constant 0 : index
    %528 = vector.load %arg14[%527, %c0_151] : memref<16x128xf32, #tpu.memory_space<vmem>>, vector<2x128xf32>
    %cst_152 = arith.constant dense<0.000000e+00> : vector<2x128xf32>
    %529 = tpu.matmul %522, %289, %cst_152 {dimension_numbers = #tpu.dot_dimension_numbers<[1], [0], [0], [1], [0, 0, 1, 1], [], []>} : vector<2x32xf32>, vector<32x128xf32>, vector<2x128xf32> -> vector<2x128xf32>
    %530 = arith.addf %528, %529 : vector<2x128xf32>
    %531 = vector.extract_strided_slice %530 {offsets = [0, 0], sizes = [2, 32], strides = [1, 1]} : vector<2x128xf32> to vector<2x32xf32>
    %532 = arith.negf %531 : vector<2x32xf32>
    %533 = math.exp %532 : vector<2x32xf32>
    %cst_153 = arith.constant 1.000000e+00 : f32
    %534 = vector.broadcast %cst_153 : f32 to vector<2x32xf32>
    %535 = arith.addf %534, %533 : vector<2x32xf32>
    %536 = arith.divf %534, %535 : vector<2x32xf32>
    %537 = vector.extract_strided_slice %530 {offsets = [0, 32], sizes = [2, 32], strides = [1, 1]} : vector<2x128xf32> to vector<2x32xf32>
    %538 = arith.negf %537 : vector<2x32xf32>
    %539 = math.exp %538 : vector<2x32xf32>
    %cst_154 = arith.constant 1.000000e+00 : f32
    %540 = vector.broadcast %cst_154 : f32 to vector<2x32xf32>
    %541 = arith.addf %540, %539 : vector<2x32xf32>
    %542 = arith.divf %540, %541 : vector<2x32xf32>
    %543 = vector.extract_strided_slice %530 {offsets = [0, 64], sizes = [2, 32], strides = [1, 1]} : vector<2x128xf32> to vector<2x32xf32>
    %544 = math.tanh %543 : vector<2x32xf32>
    %545 = vector.extract_strided_slice %530 {offsets = [0, 96], sizes = [2, 32], strides = [1, 1]} : vector<2x128xf32> to vector<2x32xf32>
    %546 = arith.negf %545 : vector<2x32xf32>
    %547 = math.exp %546 : vector<2x32xf32>
    %cst_155 = arith.constant 1.000000e+00 : f32
    %548 = vector.broadcast %cst_155 : f32 to vector<2x32xf32>
    %549 = arith.addf %548, %547 : vector<2x32xf32>
    %550 = arith.divf %548, %549 : vector<2x32xf32>
    %551 = arith.mulf %542, %520 : vector<2x32xf32>
    %552 = arith.mulf %536, %544 : vector<2x32xf32>
    %553 = arith.addf %551, %552 : vector<2x32xf32>
    %554 = math.tanh %553 : vector<2x32xf32>
    %555 = arith.mulf %550, %554 : vector<2x32xf32>
    %556 = arith.index_cast %526 : i32 to index
    %c0_156 = arith.constant 0 : index
    %557 = vector.load %arg15[%556, %c0_156] : memref<16x32xf32, #tpu.memory_space<vmem>>, vector<2x32xf32>
    tpu.vector_store %arg15[%556, %c0_156], %555 {strides = array<i32>} : memref<16x32xf32, #tpu.memory_space<vmem>>, vector<2x32xf32>,
    %c8_i32_157 = arith.constant 8 : i32
    %c1_158 = arith.constant 1 : index
    %c0_159 = arith.constant 0 : index
    %c0_160 = arith.constant 0 : index
    %558 = vector.load %arg12[%c1_158, %c0_159, %c0_160] : memref<2x2x32xf32, #tpu.memory_space<vmem>>, vector<1x2x32xf32>
    %559 = vector.shape_cast %558 : vector<1x2x32xf32> to vector<2x32xf32>
    %560 = vector.shape_cast %555 : vector<2x32xf32> to vector<1x2x32xf32>
    tpu.vector_store %arg12[%c1_158, %c0_159, %c0_160], %560 {strides = array<i32>} : memref<2x2x32xf32, #tpu.memory_space<vmem>>, vector<1x2x32xf32>,
    %c1_161 = arith.constant 1 : index
    %c0_162 = arith.constant 0 : index
    %c0_163 = arith.constant 0 : index
    %561 = vector.load %arg13[%c1_161, %c0_162, %c0_163] : memref<2x2x32xf32, #tpu.memory_space<vmem>>, vector<1x2x32xf32>
    %562 = vector.shape_cast %561 : vector<1x2x32xf32> to vector<2x32xf32>
    %563 = vector.shape_cast %553 : vector<2x32xf32> to vector<1x2x32xf32>
    tpu.vector_store %arg13[%c1_161, %c0_162, %c0_163], %563 {strides = array<i32>} : memref<2x2x32xf32, #tpu.memory_space<vmem>>, vector<1x2x32xf32>,
    %c0_164 = arith.constant 0 : index
    %c0_165 = arith.constant 0 : index
    %564 = vector.load %arg15[%c0_164, %c0_165] : memref<16x32xf32, #tpu.memory_space<vmem>>, vector<16x32xf32>
    %c0_166 = arith.constant 0 : index
    %c0_167 = arith.constant 0 : index
    %565 = vector.load %arg7[%c0_166, %c0_167] : memref<32x128xf32, #tpu.memory_space<vmem>>, vector<32x128xf32>
    %cst_168 = arith.constant dense<0.000000e+00> : vector<16x128xf32>
    %566 = tpu.matmul %564, %565, %cst_168 {dimension_numbers = #tpu.dot_dimension_numbers<[1], [0], [0], [1], [0, 0, 1, 1], [], []>} : vector<16x32xf32>, vector<32x128xf32>, vector<16x128xf32> -> vector<16x128xf32>
    %c0_169 = arith.constant 0 : index
    %c0_170 = arith.constant 0 : index
    %567 = vector.load %arg8[%c0_169, %c0_170] : memref<1x128xf32, #tpu.memory_space<vmem>>, vector<1x128xf32>
    %568 = vector.broadcast %567 : vector<1x128xf32> to vector<16x128xf32>
    %569 = arith.addf %566, %568 : vector<16x128xf32>
    %c0_171 = arith.constant 0 : index
    %c0_172 = arith.constant 0 : index
    %570 = vector.load %arg11[%c0_171, %c0_172] : memref<16x128xf32, #tpu.memory_space<vmem>>, vector<16x128xf32>
    tpu.vector_store %arg11[%c0_171, %c0_172], %569 {strides = array<i32>} : memref<16x128xf32, #tpu.memory_space<vmem>>, vector<16x128xf32>,
    return
  }
}

</mosaic_0001>

<bundles_post_ra>
// kernel: char_rnn_forward.1
= control target key start
LH: loop header
LB: loop body
LE: loop exit
PB: predicated region body
PF: predicated region fallthrough
CT: control target
= control target key end

     0   :  { %19 = vsyncpa [#allocation5], 0  ;;  %s3185_s0 = inlined_call_operand.vmem [shape: f32[16,32], index: 0, kind: input, shape index: {}]   ;;  %s3186_s1 = inlined_call_operand.vmem [shape: f32[32,128], index: 1, kind: input, shape index: {}]   ;;  %s3187_s2 = inlined_call_operand.vmem [shape: f32[32,128], index: 2, kind: input, shape index: {}]   ;;  %s3188_s3 = inlined_call_operand.vmem [shape: f32[1,128], index: 3, kind: input, shape index: {}]   ;;  %s3189_s4 = inlined_call_operand.hbm [shape: f32[32,128], index: 4, kind: input, shape index: {}]   ;;  %s3190_s5 = inlined_call_operand.vmem [shape: f32[32,128], index: 5, kind: input, shape index: {}]   ;;  %s3191_s6 = inlined_call_operand.vmem [shape: f32[1,128], index: 6, kind: input, shape index: {}]   ;;  %s3192_s7 = inlined_call_operand.vmem [shape: f32[32,128], index: 7, kind: input, shape index: {}]   ;;  %s3193_s8 = inlined_call_operand.vmem [shape: f32[1,128], index: 8, kind: input, shape index: {}]   ;;  %s3194_s9 = inlined_call_operand.vmem [shape: f32[2,2,32], index: 9, kind: input, shape index: {}]   ;;  %s3195_s10 = inlined_call_operand.vmem [shape: f32[2,2,32], index: 10, kind: input, shape index: {}]   ;;  %s3196_s11 = inlined_call_operand.vmem [shape: f32[16,128], index: 11, kind: output, shape index: {0}]   ;;  %s3197_s12 = inlined_call_operand.hbm [shape: f32[2,2,32], index: 12, kind: output, shape index: {1}]   ;;  %s3198_s13 = inlined_call_operand.hbm [shape: f32[2,2,32], index: 13, kind: output, shape index: {2}]  }
   0x1   :  { %20 = vsyncpa [#allocation6], 0 }
   0x2   :  { %21 = vsyncpa [#allocation9], 0  ;;  %s2766_s25 = smov [#allocation4]   ;;  %s2694_s29 = scalar_lea.hbm %s3189_s4, 512 }
   0x3   :  { %s35_s26 = sshll.u32 %s2766_s25, 4  ;;  %p2695_p0 = scmp.ne.s32.totalorder %s3189_s4, %s2694_s29  ;;  %s36_s26 = int_to_ptr.vmem [resolvable:$true] %s35_s26 }
   0x4   :  { %p2698_p1 = scmp.lt.u32.totalorder %s2694_s29, %s3189_s4 }
   0x6   :  { %p2700_p2 = pnand %p2698_p1, %p2695_p0 }
   0x8   :  { %2703 = shalt.err (!%p2700_p2)
}
   0x9   :  { %s2704_s17 = scalar_lea.vmem %s36_s26, 512  ;;  %p2709_p4 = scmp.lt.s32.totalorder %s36_s26, %s36_s26 }
   0xa   :  { %p2705_p3 = scmp.ne.s32.totalorder %s36_s26, %s2704_s17  ;;  %p2710_p5 = scmp.lt.s32.totalorder %s2704_s17, %s2704_s17 }
   0xc   :  { %p2711_p6 = por %p2710_p5, %p2709_p4 }
   0xe   :  { %p2712_p7 = pnand %p2711_p6, %p2705_p3 }
  0x10   :  { %2715 = shalt.err (!%p2712_p7)
}
  0x11   :  { %s2767_s18 = smov 128   ;;  %s2768_s19 = smov 8  }
  0x12   :  { %41 = dma.hbm_to_vmem [thread:$0]  %s3189_s4, 512, %s36_s26, [#allocation5], %s2767_s18, %s2767_s18, %s2768_s19  }
  0x13   :  { %2760 = dma.done.wait [#allocation5], 512  }
  0x14   :  { %2761 = vsyncadd [#allocation5], 4294966784  ;;  %v2769_v0 = vmov 0.0|0.0   ;;  %vm2770_vm0 = vmmov 0   ;;  %v2771_v1 = vmov 0.0   ;;  %vm70_vm1 = vcmask 261120  }
  0x15   :  { %2442 = vmatprep.subr.bf16.mxu1 %v2769_v0  ;;  %2244 = vmatprep.mubr.msk.f32.mxu1 %vm2770_vm0, %v2771_v1  ;;  %v59_v2 = vld [vmem:[%s3186_s1] sm:$0xff]  ;;  %v60_v3 = vld [vmem:[%s3186_s1 + $0x8] sm:$0xff]  ;;  %v61_v4 = vld [vmem:[%s3186_s1 + $0x10] sm:$0xff]  ;;  %s2772_s25 = smov 64   ;;  %vm267_vm2 = vcmask 254976   ;;  %s2776_s26 = smov [#allocation8]  }
  0x16   :  { %v2434_v5 = vpack.c.bf16 %v60_v3, %v59_v2  ;;  %v62_v6 = vld [vmem:[%s3186_s1 + $0x18] sm:$0xff]  ;;  %v57_v7 = vld [vmem:[%s3185_s0] sm:$0xff]  ;;  %v155_v10 = vld [vmem:[%s3187_s2 + $0x8] sm:$0xff]  ;;  %s2066_s27 = sshll.u32 %s2776_s26, 4  ;;  %s2067_s27 = int_to_ptr.vmem [resolvable:$true] %s2066_s27 }
  0x17   :  { %v2438_v8 = vpack.c.bf16 %v62_v6, %v61_v4  ;;  %2233 = vmatprep.mubr.msk.f32.mxu0 %vm70_vm1, %v57_v7  ;;  %v154_v9 = vld [vmem:[%s3187_s2] sm:$0xff]  ;;  %v156_v11 = vld [vmem:[%s3187_s2 + $0x10] sm:$0xff]  ;;  %v157_v13 = vld [vmem:[%s3187_s2 + $0x18] sm:$0xff] }
  0x18   :  { %2435 = vmatprep.subr.bf16.mxu0 %v2434_v5  ;;  %v2888_v12 = vpack.c.bf16 %v155_v10, %v154_v9  ;;  %v2894_v14 = vpack.c.bf16 %v157_v13, %v156_v11  ;;  %v58_v15 = vld [vmem:[%s3185_s0 + $0x8] sm:$0xff]  ;;  %v158_v16 = vld [vmem:[%s3194_s9] sm:$0x3] }
  0x19   :  { %2437 = vmatpush3.bf16.msra.mxu0 %v2434_v5  ;;  %v2084_v17 = vld [vmem:[%s3188_s3] ss:$0 sm:$0xff]  ;;  %s2773_s3 = smov 32  }
  0x1a   :  { %2439 = vmatprep.subr.bf16.mxu0 %v2438_v8  ;;  %2444 = vmatpush3.bf16.msra.mxu1 %v2888_v12  ;;  %v159_v27 = vld [vmem:[%s3195_s10] sm:$0x3] }
  0x1b   :  { %2445 = vmatprep.subr.bf16.mxu1 %v2769_v0 }
  0x1d   :  { %2441 = vmatpush3.bf16.msra.mxu0 %v2438_v8 }
  0x1e   :  { %2447 = vmatpush3.bf16.msra.mxu1 %v2894_v14  ;;  %2448 = vmatprep.subr.bf16.mxu0 %v2769_v0 }
  0x1f   :  { %2454 = vmatprep.subr.bf16.mxu1 %v2769_v0 }
  0x20   :  { %2234 = vmatmul.mubr.msk.f32.vlgmr.msra.gmra.mrb[0].mxu0 %vm70_vm1, %v58_v15 }
  0x21   :  { %2245 = vmatmul.mubr.msk.f32.vlgmr.msra.gmra.mrb[0].mxu1 %vm70_vm1, %v158_v16  ;;  %2450 = vmatpush3.bf16.msra.mxu0 %v2888_v12 }
  0x22   :  { %2451 = vmatprep.subr.bf16.mxu0 %v2769_v0  ;;  %2255 = vmatprep.mubr.msk.f32.mxu0 %vm2770_vm0, %v2771_v1 }
  0x23   :  { %2456 = vmatpush3.bf16.msra.mxu1 %v2888_v12  ;;  %2266 = vmatprep.mubr.msk.f32.mxu1 %vm2770_vm0, %v2771_v1 }
  0x24   :  { %2457 = vmatprep.subr.bf16.mxu1 %v2769_v0 }
  0x25   :  { %2453 = vmatpush3.bf16.msra.mxu0 %v2894_v14 }
  0x26   :  { %2460 = vmatprep.subr.bf16.mxu0 %v2769_v0 }
  0x27   :  { %2459 = vmatpush3.bf16.msra.mxu1 %v2894_v14 }
  0x28   :  { %2466 = vmatprep.subr.bf16.mxu1 %v2769_v0 }
  0xf3   :  { %v2235_v18 = vpop.f32.mrb[0].mxu0 }
  0xf4   :  { %v149_v19 = vadd.f32 %v2235_v18, %v2084_v17  ;;  %v143_v20 = vpop.f32.mrb[1].mxu0  ;;  %v230_v21 = vpop.f32.mrb[0].mxu1 }
  0xf5   :  { %v144_v22 = vadd.f32 %v2084_v17, %v143_v20  ;;  %v2246_v23 = vpop.f32.mrb[1].mxu1 }
  0xf6   :  { %153 = vst [vmem:[#allocation2 + $0x8] sm:$0xff] %v149_v19 }
  0xf7   :  { %152 = vst [vmem:[#allocation2] sm:$0xff] %v144_v22 }
  0xfe   :  { %v160_v24 = vld [vmem:[#allocation2] sm:$0x3]  ;;  %v270_v42 = vld [vmem:[#allocation2 + $0x2] sm:$0x3]  ;;  %v375_v60 = vld [vmem:[#allocation2 + $0x4] sm:$0x3] }
  0xff   :  { %v234_v25 = vadd.f32 %v230_v21, %v160_v24  ;;  %v480_v18 = vld [vmem:[#allocation2 + $0x6] sm:$0x3] }
 0x101   :  { %2566 = vtanh.f32 %v234_v25  ;;  %v2088_v28 = vmul.f32 -1.442695, %v234_v25 }
 0x103   :  { %2568 = vpow2.f32 %v2088_v28 }
 0x10b   :  { %v2567_v26 = vpop.eup %2566 }
 0x10c   :  { %248 = vrot.lane.b32.xlu0 %v2567_v26, %s2772_s25 }
 0x10d   :  { %v2569_v29 = vpop.eup %2568 }
 0x10e   :  { %v238_v30 = vadd.f32 1.0, %v2569_v29 }
 0x110   :  { %243 = vrot.lane.b32.xlu0 %v159_v27, %s2773_s3  ;;  %2570 = vrcp.f32 %v238_v30 }
 0x11a   :  { %v2571_v31 = vpop.eup %2570 }
 0x17e   :  { %v249_v32 = vpop.permute.xlu0 %248 }
 0x17f   :  { %v251_v33 = vmul.f32 %v2571_v31, %v249_v32 }
 0x181   :  { %253 = vrot.lane.b32.xlu1 %v251_v33, %s2773_s3 }
 0x182   :  { %v244_v34 = vpop.permute.xlu0 %243 }
 0x183   :  { %v246_v35 = vmul.f32 %v2571_v31, %v244_v34 }
 0x1f3   :  { %v254_v36 = vpop.permute.xlu1 %253 }
 0x1f4   :  { %v256_v37 = vadd.f32 %v254_v36, %v246_v35  ;;  %v585_v36 = vld [vmem:[#allocation2 + $0x8] sm:$0x3] }
 0x1f6   :  { %2572 = vtanh.f32 %v256_v37 }
 0x200   :  { %v2573_v38 = vpop.eup %2572 }
 0x201   :  { %259 = vrot.lane.b32.xlu1 %v2573_v38, %s2772_s25 }
 0x273   :  { %v260_v39 = vpop.permute.xlu1 %259 }
 0x274   :  { %v262_v40 = vmul.f32 %v2571_v31, %v260_v39 }
 0x276   :  { %264 = vrot.lane.b32.xlu0 %v262_v40, %s2773_s3 }
 0x2e8   :  { %v265_v41 = vpop.permute.xlu0 %264 }
 0x2e9   :  { %268 = vst.msk [vmem:[#allocation3] sm:$0x3] %vm267_vm2, %v265_v41  ;;  %2256 = vmatmul.mubr.msk.f32.vlgmr.msra.gmra.mrb[2].mxu0 %vm70_vm1, %v265_v41 }
 0x2ea   :  { %2462 = vmatpush3.bf16.msra.mxu0 %v2888_v12  ;;  %2277 = vmatprep.mubr.msk.f32.mxu0 %vm2770_vm0, %v2771_v1 }
 0x2eb   :  { %2463 = vmatprep.subr.bf16.mxu0 %v2769_v0 }
 0x2ee   :  { %2465 = vmatpush3.bf16.msra.mxu0 %v2894_v14 }
 0x2ef   :  { %2472 = vmatprep.subr.bf16.mxu0 %v2769_v0 }
 0x3bc   :  { %v339_v43 = vpop.f32.mrb[2].mxu0 }
 0x3bd   :  { %v343_v44 = vadd.f32 %v339_v43, %v270_v42  ;;  %v2257_v45 = vpop.f32.mrb[3].mxu0 }
 0x3bf   :  { %2574 = vtanh.f32 %v343_v44  ;;  %v2090_v47 = vmul.f32 -1.442695, %v343_v44 }
 0x3c1   :  { %2576 = vpow2.f32 %v2090_v47 }
 0x3c9   :  { %v2575_v46 = vpop.eup %2574 }
 0x3ca   :  { %353 = vrot.lane.b32.xlu1 %v2575_v46, %s2772_s25 }
 0x3cb   :  { %v2577_v48 = vpop.eup %2576 }
 0x3cc   :  { %v347_v49 = vadd.f32 1.0, %v2577_v48 }
 0x3ce   :  { %2578 = vrcp.f32 %v347_v49 }
 0x3d8   :  { %v2579_v50 = vpop.eup %2578 }
 0x3d9   :  { %v351_v53 = vmul.f32 %v2579_v50, %v256_v37 }
 0x43c   :  { %v354_v51 = vpop.permute.xlu1 %353 }
 0x43d   :  { %v356_v52 = vmul.f32 %v2579_v50, %v354_v51 }
 0x43f   :  { %358 = vrot.lane.b32.xlu0 %v356_v52, %s2773_s3 }
 0x4b1   :  { %v359_v54 = vpop.permute.xlu0 %358 }
 0x4b2   :  { %v361_v55 = vadd.f32 %v359_v54, %v351_v53  ;;  %v690_v54 = vld [vmem:[#allocation2 + $0xa] sm:$0x3] }
 0x4b4   :  { %2580 = vtanh.f32 %v361_v55 }
 0x4be   :  { %v2581_v56 = vpop.eup %2580 }
 0x4bf   :  { %364 = vrot.lane.b32.xlu1 %v2581_v56, %s2772_s25 }
 0x531   :  { %v365_v57 = vpop.permute.xlu1 %364 }
 0x532   :  { %v367_v58 = vmul.f32 %v2579_v50, %v365_v57 }
 0x534   :  { %369 = vrot.lane.b32.xlu0 %v367_v58, %s2773_s3 }
 0x5a6   :  { %v370_v59 = vpop.permute.xlu0 %369 }
 0x5a7   :  { %373 = vst.msk [vmem:[#allocation3 + $0x2] sm:$0x3] %vm267_vm2, %v370_v59  ;;  %2267 = vmatmul.mubr.msk.f32.vlgmr.msra.gmra.mrb[2].mxu1 %vm70_vm1, %v370_v59 }
 0x5a8   :  { %2468 = vmatpush3.bf16.msra.mxu1 %v2888_v12  ;;  %2288 = vmatprep.mubr.msk.f32.mxu1 %vm2770_vm0, %v2771_v1 }
 0x5a9   :  { %2469 = vmatprep.subr.bf16.mxu1 %v2769_v0 }
 0x5ac   :  { %2471 = vmatpush3.bf16.msra.mxu1 %v2894_v14 }
 0x5ad   :  { %2478 = vmatprep.subr.bf16.mxu1 %v2769_v0 }
 0x67a   :  { %v444_v61 = vpop.f32.mrb[2].mxu1 }
 0x67b   :  { %v448_v62 = vadd.f32 %v444_v61, %v375_v60  ;;  %v2268_v63 = vpop.f32.mrb[3].mxu1 }
 0x67d   :  { %2582 = vtanh.f32 %v448_v62  ;;  %v2092_v3 = vmul.f32 -1.442695, %v448_v62 }
 0x67f   :  { %2584 = vpow2.f32 %v2092_v3 }
 0x687   :  { %v2583_v2 = vpop.eup %2582 }
 0x688   :  { %458 = vrot.lane.b32.xlu1 %v2583_v2, %s2772_s25 }
 0x689   :  { %v2585_v4 = vpop.eup %2584 }
 0x68a   :  { %v452_v5 = vadd.f32 1.0, %v2585_v4 }
 0x68c   :  { %2586 = vrcp.f32 %v452_v5 }
 0x696   :  { %v2587_v6 = vpop.eup %2586 }
 0x697   :  { %v456_v9 = vmul.f32 %v2587_v6, %v361_v55 }
 0x6fa   :  { %v459_v7 = vpop.permute.xlu1 %458 }
 0x6fb   :  { %v461_v8 = vmul.f32 %v2587_v6, %v459_v7 }
 0x6fd   :  { %463 = vrot.lane.b32.xlu0 %v461_v8, %s2773_s3 }
 0x76f   :  { %v464_v10 = vpop.permute.xlu0 %463 }
 0x770   :  { %v466_v11 = vadd.f32 %v464_v10, %v456_v9  ;;  %v795_v9 = vld [vmem:[#allocation2 + $0xc] sm:$0x3] }
 0x772   :  { %2588 = vtanh.f32 %v466_v11 }
 0x77c   :  { %v2589_v13 = vpop.eup %2588 }
 0x77d   :  { %469 = vrot.lane.b32.xlu1 %v2589_v13, %s2772_s25 }
 0x7ef   :  { %v470_v15 = vpop.permute.xlu1 %469 }
 0x7f0   :  { %v472_v16 = vmul.f32 %v2587_v6, %v470_v15 }
 0x7f2   :  { %474 = vrot.lane.b32.xlu0 %v472_v16, %s2773_s3 }
 0x864   :  { %v475_v17 = vpop.permute.xlu0 %474 }
 0x865   :  { %478 = vst.msk [vmem:[#allocation3 + $0x4] sm:$0x3] %vm267_vm2, %v475_v17  ;;  %2278 = vmatmul.mubr.msk.f32.vlgmr.msra.gmra.mrb[4].mxu0 %vm70_vm1, %v475_v17 }
 0x866   :  { %2474 = vmatpush3.bf16.msra.mxu0 %v2888_v12  ;;  %2299 = vmatprep.mubr.msk.f32.mxu0 %vm2770_vm0, %v2771_v1 }
 0x867   :  { %2475 = vmatprep.subr.bf16.mxu0 %v2769_v0 }
 0x86a   :  { %2477 = vmatpush3.bf16.msra.mxu0 %v2894_v14 }
 0x86b   :  { %2484 = vmatprep.subr.bf16.mxu0 %v2769_v0 }
 0x938   :  { %v549_v19 = vpop.f32.mrb[4].mxu0 }
 0x939   :  { %v553_v20 = vadd.f32 %v549_v19, %v480_v18  ;;  %v2279_v21 = vpop.f32.mrb[5].mxu0 }
 0x93b   :  { %2590 = vtanh.f32 %v553_v20  ;;  %v2094_v23 = vmul.f32 -1.442695, %v553_v20 }
 0x93d   :  { %2592 = vpow2.f32 %v2094_v23 }
 0x945   :  { %v2591_v22 = vpop.eup %2590 }
 0x946   :  { %563 = vrot.lane.b32.xlu1 %v2591_v22, %s2772_s25 }
 0x947   :  { %v2593_v24 = vpop.eup %2592 }
 0x948   :  { %v557_v25 = vadd.f32 1.0, %v2593_v24 }
 0x94a   :  { %2594 = vrcp.f32 %v557_v25 }
 0x954   :  { %v2595_v26 = vpop.eup %2594 }
 0x955   :  { %v561_v29 = vmul.f32 %v2595_v26, %v466_v11 }
 0x9b8   :  { %v564_v27 = vpop.permute.xlu1 %563 }
 0x9b9   :  { %v566_v28 = vmul.f32 %v2595_v26, %v564_v27 }
 0x9bb   :  { %568 = vrot.lane.b32.xlu0 %v566_v28, %s2773_s3 }
 0xa2d   :  { %v569_v30 = vpop.permute.xlu0 %568 }
 0xa2e   :  { %v571_v31 = vadd.f32 %v569_v30, %v561_v29  ;;  %v900_v29 = vld [vmem:[#allocation2 + $0xe] sm:$0x3] }
 0xa30   :  { %2596 = vtanh.f32 %v571_v31 }
 0xa3a   :  { %v2597_v32 = vpop.eup %2596 }
 0xa3b   :  { %574 = vrot.lane.b32.xlu1 %v2597_v32, %s2772_s25 }
 0xaad   :  { %v575_v33 = vpop.permute.xlu1 %574 }
 0xaae   :  { %v577_v34 = vmul.f32 %v2595_v26, %v575_v33 }
 0xab0   :  { %579 = vrot.lane.b32.xlu0 %v577_v34, %s2773_s3 }
 0xb22   :  { %v580_v35 = vpop.permute.xlu0 %579 }
 0xb23   :  { %583 = vst.msk [vmem:[#allocation3 + $0x6] sm:$0x3] %vm267_vm2, %v580_v35  ;;  %2289 = vmatmul.mubr.msk.f32.vlgmr.msra.gmra.mrb[4].mxu1 %vm70_vm1, %v580_v35 }
 0xb24   :  { %2480 = vmatpush3.bf16.msra.mxu1 %v2888_v12  ;;  %2310 = vmatprep.mubr.msk.f32.mxu1 %vm2770_vm0, %v2771_v1 }
 0xb25   :  { %2481 = vmatprep.subr.bf16.mxu1 %v2769_v0 }
 0xb28   :  { %2483 = vmatpush3.bf16.msra.mxu1 %v2894_v14 }
 0xb2a   :  { %v1010_v8 = vld [vmem:[#allocation3] sm:$0xff] }
 0xbf6   :  { %v654_v37 = vpop.f32.mrb[4].mxu1 }
 0xbf7   :  { %v658_v38 = vadd.f32 %v654_v37, %v585_v36  ;;  %v2290_v39 = vpop.f32.mrb[5].mxu1 }
 0xbf9   :  { %2598 = vtanh.f32 %v658_v38  ;;  %v2096_v41 = vmul.f32 -1.442695, %v658_v38 }
 0xbfb   :  { %2600 = vpow2.f32 %v2096_v41 }
 0xc03   :  { %v2599_v40 = vpop.eup %2598 }
 0xc04   :  { %668 = vrot.lane.b32.xlu1 %v2599_v40, %s2772_s25 }
 0xc05   :  { %v2601_v42 = vpop.eup %2600 }
 0xc06   :  { %v662_v43 = vadd.f32 1.0, %v2601_v42 }
 0xc08   :  { %2602 = vrcp.f32 %v662_v43 }
 0xc12   :  { %v2603_v44 = vpop.eup %2602 }
 0xc13   :  { %v666_v47 = vmul.f32 %v2603_v44, %v571_v31 }
 0xc76   :  { %v669_v45 = vpop.permute.xlu1 %668 }
 0xc77   :  { %v671_v46 = vmul.f32 %v2603_v44, %v669_v45  ;;  %v1013_v45 = vld [vmem:[#allocation4 + $0x8] sm:$0xff] }
 0xc79   :  { %673 = vrot.lane.b32.xlu0 %v671_v46, %s2773_s3 }
 0xceb   :  { %v674_v48 = vpop.permute.xlu0 %673 }
 0xcec   :  { %v676_v49 = vadd.f32 %v674_v48, %v666_v47  ;;  %v1014_v47 = vld [vmem:[#allocation4 + $0x10] sm:$0xff]  ;;  %v1015_v48 = vld [vmem:[#allocation4 + $0x18] sm:$0xff] }
 0xcee   :  { %2604 = vtanh.f32 %v676_v49 }
 0xcf8   :  { %v2605_v50 = vpop.eup %2604 }
 0xcf9   :  { %679 = vrot.lane.b32.xlu1 %v2605_v50, %s2772_s25  ;;  %v1106_v50 = vld [vmem:[%s3190_s5] sm:$0xff] }
 0xd6b   :  { %v680_v51 = vpop.permute.xlu1 %679 }
 0xd6c   :  { %v682_v52 = vmul.f32 %v2603_v44, %v680_v51  ;;  %v1012_v44 = vld [vmem:[#allocation4] sm:$0xff]  ;;  %v1107_v51 = vld [vmem:[%s3190_s5 + $0x8] sm:$0xff] }
 0xd6d   :  { %v2490_v46 = vpack.c.bf16 %v1013_v45, %v1012_v44 }
 0xd6e   :  { %684 = vrot.lane.b32.xlu0 %v682_v52, %s2773_s3  ;;  %v1108_v52 = vld [vmem:[%s3190_s5 + $0x10] sm:$0xff] }
 0xd6f   :  { %2491 = vmatprep.subr.bf16.mxu1 %v2490_v46 }
 0xde0   :  { %v685_v53 = vpop.permute.xlu0 %684 }
 0xde1   :  { %688 = vst.msk [vmem:[#allocation3 + $0x8] sm:$0x3] %vm267_vm2, %v685_v53  ;;  %2300 = vmatmul.mubr.msk.f32.vlgmr.msra.gmra.mrb[6].mxu0 %vm70_vm1, %v685_v53  ;;  %v3017_v53 = vpack.c.bf16 %v1107_v51, %v1106_v50 }
 0xde2   :  { %2486 = vmatpush3.bf16.msra.mxu0 %v2888_v12  ;;  %2321 = vmatprep.mubr.msk.f32.mxu0 %vm2770_vm0, %v2771_v1 }
 0xde3   :  { %2487 = vmatprep.subr.bf16.mxu0 %v2769_v0 }
 0xde6   :  { %2489 = vmatpush3.bf16.msra.mxu0 %v2894_v14 }
 0xde7   :  { %2498 = vmatprep.subr.bf16.mxu0 %v2769_v0 }
 0xeb4   :  { %v759_v55 = vpop.f32.mrb[6].mxu0 }
 0xeb5   :  { %v763_v56 = vadd.f32 %v759_v55, %v690_v54  ;;  %v2301_v57 = vpop.f32.mrb[7].mxu0  ;;  %v1109_v54 = vld [vmem:[%s3190_s5 + $0x18] sm:$0xff] }
 0xeb6   :  { %v3023_v57 = vpack.c.bf16 %v1109_v54, %v1108_v52 }
 0xeb7   :  { %2606 = vtanh.f32 %v763_v56  ;;  %v2098_v59 = vmul.f32 -1.442695, %v763_v56 }
 0xeb9   :  { %2608 = vpow2.f32 %v2098_v59  ;;  %v2106_v59 = vld [vmem:[%s3194_s9 + $0x2] sm:$0x3] }
 0xec1   :  { %v2607_v58 = vpop.eup %2606 }
 0xec2   :  { %773 = vrot.lane.b32.xlu1 %v2607_v58, %s2772_s25  ;;  %v2107_v58 = vld [vmem:[%s3195_s10 + $0x2] sm:$0x3] }
 0xec3   :  { %v2609_v12 = vpop.eup %2608 }
 0xec4   :  { %v767_v60 = vadd.f32 1.0, %v2609_v12 }
 0xec6   :  { %2610 = vrcp.f32 %v767_v60 }
 0xed0   :  { %v2611_v61 = vpop.eup %2610 }
 0xed1   :  { %v771_v14 = vmul.f32 %v2611_v61, %v676_v49  ;;  %v2494_v49 = vpack.c.bf16 %v1015_v48, %v1014_v47 }
 0xf34   :  { %v774_v62 = vpop.permute.xlu1 %773 }
 0xf35   :  { %v776_v63 = vmul.f32 %v2611_v61, %v774_v62 }
 0xf37   :  { %778 = vrot.lane.b32.xlu0 %v776_v63, %s2773_s3  ;;  %v2103_v63 = vld [vmem:[%s3191_s6] ss:$0 sm:$0xff]  ;;  %s2774_s6 = smov 96  }
 0xfa9   :  { %v779_v2 = vpop.permute.xlu0 %778 }
 0xfaa   :  { %v781_v3 = vadd.f32 %v779_v2, %v771_v14 }
 0xfac   :  { %2612 = vtanh.f32 %v781_v3 }
 0xfb6   :  { %v2613_v4 = vpop.eup %2612 }
 0xfb7   :  { %784 = vrot.lane.b32.xlu1 %v2613_v4, %s2772_s25 }
0x1029   :  { %v785_v5 = vpop.permute.xlu1 %784 }
0x102a   :  { %v787_v6 = vmul.f32 %v2611_v61, %v785_v5 }
0x102c   :  { %789 = vrot.lane.b32.xlu0 %v787_v6, %s2773_s3 }
0x109e   :  { %v790_v7 = vpop.permute.xlu0 %789 }
0x109f   :  { %793 = vst.msk [vmem:[#allocation3 + $0xa] sm:$0x3] %vm267_vm2, %v790_v7  ;;  %2311 = vmatmul.mubr.msk.f32.vlgmr.msra.gmra.mrb[6].mxu1 %vm70_vm1, %v790_v7 }
0x10a0   :  { %2332 = vmatprep.mubr.msk.f32.mxu1 %vm70_vm1, %v1010_v8  ;;  %2493 = vmatpush3.bf16.msra.mxu1 %v2490_v46 }
0x10a1   :  { %2495 = vmatprep.subr.bf16.mxu1 %v2494_v49 }
0x10a4   :  { %2497 = vmatpush3.bf16.msra.mxu1 %v2494_v49 }
0x10a5   :  { %2504 = vmatprep.subr.bf16.mxu1 %v2769_v0 }
0x1172   :  { %v864_v10 = vpop.f32.mrb[6].mxu1 }
0x1173   :  { %v868_v11 = vadd.f32 %v864_v10, %v795_v9  ;;  %v2312_v13 = vpop.f32.mrb[7].mxu1 }
0x1175   :  { %2614 = vtanh.f32 %v868_v11  ;;  %v2100_v16 = vmul.f32 -1.442695, %v868_v11 }
0x1177   :  { %2616 = vpow2.f32 %v2100_v16 }
0x117f   :  { %v2615_v15 = vpop.eup %2614 }
0x1180   :  { %878 = vrot.lane.b32.xlu1 %v2615_v15, %s2772_s25 }
0x1181   :  { %v2617_v17 = vpop.eup %2616 }
0x1182   :  { %v872_v18 = vadd.f32 1.0, %v2617_v17 }
0x1184   :  { %2618 = vrcp.f32 %v872_v18 }
0x118e   :  { %v2619_v19 = vpop.eup %2618 }
0x118f   :  { %v876_v22 = vmul.f32 %v2619_v19, %v781_v3 }
0x11f2   :  { %v879_v20 = vpop.permute.xlu1 %878 }
0x11f3   :  { %v881_v21 = vmul.f32 %v2619_v19, %v879_v20 }
0x11f5   :  { %883 = vrot.lane.b32.xlu0 %v881_v21, %s2773_s3 }
0x1267   :  { %v884_v23 = vpop.permute.xlu0 %883 }
0x1268   :  { %v886_v24 = vadd.f32 %v884_v23, %v876_v22 }
0x126a   :  { %2620 = vtanh.f32 %v886_v24 }
0x1274   :  { %v2621_v25 = vpop.eup %2620 }
0x1275   :  { %889 = vrot.lane.b32.xlu1 %v2621_v25, %s2772_s25 }
0x12e7   :  { %v890_v26 = vpop.permute.xlu1 %889 }
0x12e8   :  { %v892_v27 = vmul.f32 %v2619_v19, %v890_v26 }
0x12ea   :  { %894 = vrot.lane.b32.xlu0 %v892_v27, %s2773_s3 }
0x135c   :  { %v895_v28 = vpop.permute.xlu0 %894 }
0x135d   :  { %898 = vst.msk [vmem:[#allocation3 + $0xc] sm:$0x3] %vm267_vm2, %v895_v28  ;;  %2322 = vmatmul.mubr.msk.f32.vlgmr.msra.gmra.mrb[8].mxu0 %vm70_vm1, %v895_v28 }
0x135e   :  { %2343 = vmatprep.mubr.msk.f32.mxu0 %vm2770_vm0, %v2771_v1  ;;  %2500 = vmatpush3.bf16.msra.mxu0 %v3017_v53 }
0x135f   :  { %2501 = vmatprep.subr.bf16.mxu0 %v2769_v0 }
0x1362   :  { %2503 = vmatpush3.bf16.msra.mxu0 %v3023_v57 }
0x1363   :  { %2510 = vmatprep.subr.bf16.mxu0 %v2769_v0 }
0x1365   :  { %2344 = vmatmul.mubr.msk.f32.vlgmr.msra.gmra.mrb[10].mxu0 %vm70_vm1, %v2106_v59 }
0x1366   :  { %2512 = vmatpush3.bf16.msra.mxu0 %v3017_v53  ;;  %2365 = vmatprep.mubr.msk.f32.mxu0 %vm2770_vm0, %v2771_v1 }
0x1367   :  { %2513 = vmatprep.subr.bf16.mxu0 %v2769_v0 }
0x136a   :  { %2515 = vmatpush3.bf16.msra.mxu0 %v3023_v57 }
0x136b   :  { %2522 = vmatprep.subr.bf16.mxu0 %v2769_v0 }
0x1430   :  { %v969_v30 = vpop.f32.mrb[8].mxu0 }
0x1431   :  { %v973_v31 = vadd.f32 %v969_v30, %v900_v29  ;;  %v2323_v32 = vpop.f32.mrb[9].mxu0 }
0x1433   :  { %2622 = vtanh.f32 %v973_v31  ;;  %v2102_v34 = vmul.f32 -1.442695, %v973_v31 }
0x1435   :  { %2624 = vpow2.f32 %v2102_v34 }
0x1438   :  { %v1184_v61 = vpop.f32.mrb[10].mxu0 }
0x1439   :  { %v2345_v62 = vpop.f32.mrb[11].mxu0 }
0x143d   :  { %v2623_v33 = vpop.eup %2622 }
0x143e   :  { %983 = vrot.lane.b32.xlu1 %v2623_v33, %s2772_s25 }
0x143f   :  { %v2625_v35 = vpop.eup %2624 }
0x1440   :  { %v977_v36 = vadd.f32 1.0, %v2625_v35 }
0x1442   :  { %2626 = vrcp.f32 %v977_v36 }
0x144c   :  { %v2627_v37 = vpop.eup %2626 }
0x144d   :  { %v981_v40 = vmul.f32 %v2627_v37, %v886_v24 }
0x14b0   :  { %v984_v38 = vpop.permute.xlu1 %983 }
0x14b1   :  { %v986_v39 = vmul.f32 %v2627_v37, %v984_v38 }
0x14b3   :  { %988 = vrot.lane.b32.xlu0 %v986_v39, %s2773_s3 }
0x1525   :  { %v989_v41 = vpop.permute.xlu0 %988 }
0x1526   :  { %v3003_v42 = vadd.f32 %v989_v41, %v981_v40 }
0x1528   :  { %2628 = vtanh.f32 %v3003_v42 }
0x1532   :  { %v2629_v43 = vpop.eup %2628 }
0x1533   :  { %994 = vrot.lane.b32.xlu1 %v2629_v43, %s2772_s25 }
0x15a5   :  { %v995_v55 = vpop.permute.xlu1 %994 }
0x15a6   :  { %v997_v56 = vmul.f32 %v2627_v37, %v995_v55 }
0x15a8   :  { %999 = vrot.lane.b32.xlu0 %v997_v56, %s2773_s3 }
0x15ac   :  { %1197 = vrot.lane.b32.xlu0 %v2107_v58, %s2773_s3 }
0x161a   :  { %v1000_v12 = vpop.permute.xlu0 %999 }
0x161b   :  { %1003 = vst.msk [vmem:[#allocation3 + $0xe] sm:$0x3] %vm267_vm2, %v1000_v12  ;;  %1004 = vst.msk [vmem:[#allocation7] sm:$0x3] %vm267_vm2, %v1000_v12 }
0x161e   :  { %v1198_v16 = vpop.permute.xlu0 %1197 }
0x1622   :  { %v1011_v60 = vld [vmem:[#allocation3 + $0x8] sm:$0xff] }
0x1623   :  { %2333 = vmatmul.mubr.msk.f32.vlgmr.msra.gmra.mrb[8].mxu1 %vm70_vm1, %v1011_v60 }
0x1624   :  { %2506 = vmatpush3.bf16.msra.mxu1 %v3017_v53  ;;  %2354 = vmatprep.mubr.msk.f32.mxu1 %vm2770_vm0, %v2771_v1 }
0x1625   :  { %2507 = vmatprep.subr.bf16.mxu1 %v2769_v0 }
0x1628   :  { %2509 = vmatpush3.bf16.msra.mxu1 %v3023_v57 }
0x1629   :  { %2516 = vmatprep.subr.bf16.mxu1 %v2769_v0 }
0x16f6   :  { %v2334_v14 = vpop.f32.mrb[8].mxu1 }
0x16f7   :  { %v1101_v2 = vadd.f32 %v2334_v14, %v2103_v63  ;;  %v1095_v3 = vpop.f32.mrb[9].mxu1 }
0x16f8   :  { %v1096_v4 = vadd.f32 %v2103_v63, %v1095_v3 }
0x16f9   :  { %1105 = vst [vmem:[#allocation2 + $0x8] sm:$0xff] %v1101_v2 }
0x16fa   :  { %1104 = vst [vmem:[#allocation2] sm:$0xff] %v1096_v4 }
0x1701   :  { %v1114_v5 = vld [vmem:[#allocation2] sm:$0x3]  ;;  %v1222_v24 = vld [vmem:[#allocation2 + $0x2] sm:$0x3]  ;;  %v1325_v43 = vld [vmem:[#allocation2 + $0x4] sm:$0x3] }
0x1702   :  { %v1188_v6 = vadd.f32 %v1184_v61, %v1114_v5  ;;  %v1428_v62 = vld [vmem:[#allocation2 + $0x6] sm:$0x3] }
0x1704   :  { %2630 = vtanh.f32 %v1188_v6  ;;  %v2109_v8 = vmul.f32 -1.442695, %v1188_v6 }
0x1706   :  { %2632 = vpow2.f32 %v2109_v8 }
0x170e   :  { %v2631_v7 = vpop.eup %2630 }
0x170f   :  { %1202 = vrot.lane.b32.xlu1 %v2631_v7, %s2772_s25 }
0x1710   :  { %v2633_v9 = vpop.eup %2632 }
0x1711   :  { %v1192_v10 = vadd.f32 1.0, %v2633_v9 }
0x1713   :  { %2634 = vrcp.f32 %v1192_v10 }
0x171d   :  { %v2635_v11 = vpop.eup %2634 }
0x171e   :  { %v1200_v17 = vmul.f32 %v2635_v11, %v1198_v16 }
0x1781   :  { %v1203_v13 = vpop.permute.xlu1 %1202 }
0x1782   :  { %v1205_v15 = vmul.f32 %v2635_v11, %v1203_v13 }
0x1784   :  { %1207 = vrot.lane.b32.xlu1 %v1205_v15, %s2773_s3 }
0x17f6   :  { %v1208_v18 = vpop.permute.xlu1 %1207 }
0x17f7   :  { %v1210_v19 = vadd.f32 %v1208_v18, %v1200_v17 }
0x17f9   :  { %2636 = vtanh.f32 %v1210_v19 }
0x1803   :  { %v2637_v20 = vpop.eup %2636 }
0x1804   :  { %1213 = vrot.lane.b32.xlu0 %v2637_v20, %s2772_s25 }
0x1876   :  { %v1214_v21 = vpop.permute.xlu0 %1213 }
0x1877   :  { %v1216_v22 = vmul.f32 %v2635_v11, %v1214_v21 }
0x1879   :  { %1218 = vrot.lane.b32.xlu1 %v1216_v22, %s2773_s3 }
0x18eb   :  { %v1219_v23 = vpop.permute.xlu1 %1218 }
0x18ec   :  { %1221 = vst.msk [vmem:[#allocation3] sm:$0x3] %vm267_vm2, %v1219_v23  ;;  %2355 = vmatmul.mubr.msk.f32.vlgmr.msra.gmra.mrb[10].mxu1 %vm70_vm1, %v1219_v23 }
0x18ed   :  { %2518 = vmatpush3.bf16.msra.mxu1 %v3017_v53  ;;  %2376 = vmatprep.mubr.msk.f32.mxu1 %vm2770_vm0, %v2771_v1 }
0x18ee   :  { %2519 = vmatprep.subr.bf16.mxu1 %v2769_v0 }
0x18f1   :  { %2521 = vmatpush3.bf16.msra.mxu1 %v3023_v57 }
0x18f2   :  { %2528 = vmatprep.subr.bf16.mxu1 %v2769_v0 }
0x19bf   :  { %v1291_v25 = vpop.f32.mrb[10].mxu1 }
0x19c0   :  { %v1295_v26 = vadd.f32 %v1291_v25, %v1222_v24  ;;  %v2356_v27 = vpop.f32.mrb[11].mxu1 }
0x19c2   :  { %2638 = vtanh.f32 %v1295_v26  ;;  %v2111_v29 = vmul.f32 -1.442695, %v1295_v26 }
0x19c4   :  { %2640 = vpow2.f32 %v2111_v29 }
0x19cc   :  { %v2639_v28 = vpop.eup %2638 }
0x19cd   :  { %1305 = vrot.lane.b32.xlu0 %v2639_v28, %s2772_s25 }
0x19ce   :  { %v2641_v30 = vpop.eup %2640 }
0x19cf   :  { %v1299_v31 = vadd.f32 1.0, %v2641_v30 }
0x19d1   :  { %2642 = vrcp.f32 %v1299_v31 }
0x19db   :  { %v2643_v32 = vpop.eup %2642 }
0x19dc   :  { %v1303_v35 = vmul.f32 %v2643_v32, %v1210_v19  ;;  %v1531_v19 = vld [vmem:[#allocation2 + $0x8] sm:$0x3] }
0x1a3f   :  { %v1306_v33 = vpop.permute.xlu0 %1305 }
0x1a40   :  { %v1308_v34 = vmul.f32 %v2643_v32, %v1306_v33 }
0x1a42   :  { %1310 = vrot.lane.b32.xlu1 %v1308_v34, %s2773_s3 }
0x1ab4   :  { %v1311_v36 = vpop.permute.xlu1 %1310 }
0x1ab5   :  { %v1313_v37 = vadd.f32 %v1311_v36, %v1303_v35 }
0x1ab7   :  { %2644 = vtanh.f32 %v1313_v37 }
0x1ac1   :  { %v2645_v38 = vpop.eup %2644 }
0x1ac2   :  { %1316 = vrot.lane.b32.xlu0 %v2645_v38, %s2772_s25 }
0x1b34   :  { %v1317_v39 = vpop.permute.xlu0 %1316 }
0x1b35   :  { %v1319_v40 = vmul.f32 %v2643_v32, %v1317_v39 }
0x1b37   :  { %1321 = vrot.lane.b32.xlu1 %v1319_v40, %s2773_s3 }
0x1ba9   :  { %v1322_v41 = vpop.permute.xlu1 %1321 }
0x1baa   :  { %1324 = vst.msk [vmem:[#allocation3 + $0x2] sm:$0x3] %vm267_vm2, %v1322_v41  ;;  %2366 = vmatmul.mubr.msk.f32.vlgmr.msra.gmra.mrb[12].mxu0 %vm70_vm1, %v1322_v41 }
0x1bab   :  { %2524 = vmatpush3.bf16.msra.mxu0 %v3017_v53  ;;  %2387 = vmatprep.mubr.msk.f32.mxu0 %vm2770_vm0, %v2771_v1 }
0x1bac   :  { %2525 = vmatprep.subr.bf16.mxu0 %v2769_v0 }
0x1baf   :  { %2527 = vmatpush3.bf16.msra.mxu0 %v3023_v57 }
0x1bb0   :  { %2534 = vmatprep.subr.bf16.mxu0 %v2769_v0 }
0x1c7d   :  { %v1394_v44 = vpop.f32.mrb[12].mxu0 }
0x1c7e   :  { %v1398_v45 = vadd.f32 %v1394_v44, %v1325_v43  ;;  %v2367_v46 = vpop.f32.mrb[13].mxu0 }
0x1c80   :  { %2646 = vtanh.f32 %v1398_v45  ;;  %v2113_v48 = vmul.f32 -1.442695, %v1398_v45 }
0x1c82   :  { %2648 = vpow2.f32 %v2113_v48 }
0x1c8a   :  { %v2647_v47 = vpop.eup %2646 }
0x1c8b   :  { %1408 = vrot.lane.b32.xlu0 %v2647_v47, %s2772_s25 }
0x1c8c   :  { %v2649_v49 = vpop.eup %2648 }
0x1c8d   :  { %v1402_v50 = vadd.f32 1.0, %v2649_v49 }
0x1c8f   :  { %2650 = vrcp.f32 %v1402_v50 }
0x1c99   :  { %v2651_v51 = vpop.eup %2650 }
0x1c9a   :  { %v1406_v55 = vmul.f32 %v2651_v51, %v1313_v37  ;;  %v1634_v37 = vld [vmem:[#allocation2 + $0xa] sm:$0x3] }
0x1cfd   :  { %v1409_v52 = vpop.permute.xlu0 %1408 }
0x1cfe   :  { %v1411_v54 = vmul.f32 %v2651_v51, %v1409_v52 }
0x1d00   :  { %1413 = vrot.lane.b32.xlu1 %v1411_v54, %s2773_s3  ;;  %v1737_v54 = vld [vmem:[#allocation2 + $0xc] sm:$0x3] }
0x1d72   :  { %v1414_v56 = vpop.permute.xlu1 %1413 }
0x1d73   :  { %v1416_v58 = vadd.f32 %v1414_v56, %v1406_v55 }
0x1d75   :  { %2652 = vtanh.f32 %v1416_v58 }
0x1d7f   :  { %v2653_v59 = vpop.eup %2652 }
0x1d80   :  { %1419 = vrot.lane.b32.xlu0 %v2653_v59, %s2772_s25 }
0x1df2   :  { %v1420_v12 = vpop.permute.xlu0 %1419 }
0x1df3   :  { %v1422_v60 = vmul.f32 %v2651_v51, %v1420_v12 }
0x1df5   :  { %1424 = vrot.lane.b32.xlu1 %v1422_v60, %s2773_s3 }
0x1e67   :  { %v1425_v61 = vpop.permute.xlu1 %1424 }
0x1e68   :  { %1427 = vst.msk [vmem:[#allocation3 + $0x4] sm:$0x3] %vm267_vm2, %v1425_v61  ;;  %2377 = vmatmul.mubr.msk.f32.vlgmr.msra.gmra.mrb[12].mxu1 %vm70_vm1, %v1425_v61 }
0x1e69   :  { %2530 = vmatpush3.bf16.msra.mxu1 %v3017_v53  ;;  %2398 = vmatprep.mubr.msk.f32.mxu1 %vm2770_vm0, %v2771_v1 }
0x1e6a   :  { %2531 = vmatprep.subr.bf16.mxu1 %v2769_v0 }
0x1e6d   :  { %2533 = vmatpush3.bf16.msra.mxu1 %v3023_v57 }
0x1e6e   :  { %2540 = vmatprep.subr.bf16.mxu1 %v2769_v0 }
0x1f3b   :  { %v1497_v63 = vpop.f32.mrb[12].mxu1 }
0x1f3c   :  { %v1501_v14 = vadd.f32 %v1497_v63, %v1428_v62  ;;  %v2378_v2 = vpop.f32.mrb[13].mxu1 }
0x1f3e   :  { %2654 = vtanh.f32 %v1501_v14  ;;  %v2115_v4 = vmul.f32 -1.442695, %v1501_v14 }
0x1f40   :  { %2656 = vpow2.f32 %v2115_v4 }
0x1f48   :  { %v2655_v3 = vpop.eup %2654 }
0x1f49   :  { %1511 = vrot.lane.b32.xlu0 %v2655_v3, %s2772_s25 }
0x1f4a   :  { %v2657_v5 = vpop.eup %2656 }
0x1f4b   :  { %v1505_v6 = vadd.f32 1.0, %v2657_v5 }
0x1f4d   :  { %2658 = vrcp.f32 %v1505_v6 }
0x1f57   :  { %v2659_v7 = vpop.eup %2658 }
0x1f58   :  { %v1509_v10 = vmul.f32 %v2659_v7, %v1416_v58 }
0x1fbb   :  { %v1512_v8 = vpop.permute.xlu0 %1511 }
0x1fbc   :  { %v1514_v9 = vmul.f32 %v2659_v7, %v1512_v8 }
0x1fbe   :  { %1516 = vrot.lane.b32.xlu1 %v1514_v9, %s2773_s3  ;;  %v1840_v9 = vld [vmem:[#allocation2 + $0xe] sm:$0x3] }
0x2030   :  { %v1517_v11 = vpop.permute.xlu1 %1516 }
0x2031   :  { %v1519_v13 = vadd.f32 %v1517_v11, %v1509_v10 }
0x2033   :  { %2660 = vtanh.f32 %v1519_v13 }
0x203d   :  { %v2661_v15 = vpop.eup %2660 }
0x203e   :  { %1522 = vrot.lane.b32.xlu0 %v2661_v15, %s2772_s25 }
0x20b0   :  { %v1523_v16 = vpop.permute.xlu0 %1522 }
0x20b1   :  { %v1525_v17 = vmul.f32 %v2659_v7, %v1523_v16 }
0x20b3   :  { %1527 = vrot.lane.b32.xlu1 %v1525_v17, %s2773_s3 }
0x2125   :  { %v1528_v18 = vpop.permute.xlu1 %1527 }
0x2126   :  { %1530 = vst.msk [vmem:[#allocation3 + $0x6] sm:$0x3] %vm267_vm2, %v1528_v18  ;;  %2388 = vmatmul.mubr.msk.f32.vlgmr.msra.gmra.mrb[14].mxu0 %vm70_vm1, %v1528_v18 }
0x2127   :  { %2536 = vmatpush3.bf16.msra.mxu0 %v3017_v53  ;;  %2409 = vmatprep.mubr.msk.f32.mxu0 %vm2770_vm0, %v2771_v1 }
0x2128   :  { %2537 = vmatprep.subr.bf16.mxu0 %v2769_v0 }
0x212b   :  { %2539 = vmatpush3.bf16.msra.mxu0 %v3023_v57 }
0x212d   :  { %v1951_v52 = vld [vmem:[#allocation3] sm:$0xff] }
0x21f9   :  { %v1600_v20 = vpop.f32.mrb[14].mxu0 }
0x21fa   :  { %v1604_v21 = vadd.f32 %v1600_v20, %v1531_v19  ;;  %v2389_v22 = vpop.f32.mrb[15].mxu0 }
0x21fc   :  { %2662 = vtanh.f32 %v1604_v21  ;;  %v2117_v24 = vmul.f32 -1.442695, %v1604_v21 }
0x21fe   :  { %2664 = vpow2.f32 %v2117_v24 }
0x2206   :  { %v2663_v23 = vpop.eup %2662 }
0x2207   :  { %1614 = vrot.lane.b32.xlu0 %v2663_v23, %s2772_s25 }
0x2208   :  { %v2665_v25 = vpop.eup %2664 }
0x2209   :  { %v1608_v26 = vadd.f32 1.0, %v2665_v25 }
0x220b   :  { %2666 = vrcp.f32 %v1608_v26  ;;  %v1953_v26 = vld [vmem:[%s3192_s7] sm:$0xff] }
0x2215   :  { %v2667_v27 = vpop.eup %2666 }
0x2216   :  { %v1612_v30 = vmul.f32 %v2667_v27, %v1519_v13 }
0x2279   :  { %v1615_v28 = vpop.permute.xlu0 %1614 }
0x227a   :  { %v1617_v29 = vmul.f32 %v2667_v27, %v1615_v28 }
0x227c   :  { %1619 = vrot.lane.b32.xlu1 %v1617_v29, %s2773_s3  ;;  %v1955_v29 = vld [vmem:[%s3192_s7 + $0x10] sm:$0xff] }
0x22ee   :  { %v1620_v31 = vpop.permute.xlu1 %1619 }
0x22ef   :  { %v1622_v32 = vadd.f32 %v1620_v31, %v1612_v30  ;;  %v1956_v30 = vld [vmem:[%s3192_s7 + $0x18] sm:$0xff] }
0x22f1   :  { %2668 = vtanh.f32 %v1622_v32 }
0x22fb   :  { %v2669_v33 = vpop.eup %2668 }
0x22fc   :  { %1625 = vrot.lane.b32.xlu0 %v2669_v33, %s2772_s25 }
0x236e   :  { %v1626_v34 = vpop.permute.xlu0 %1625 }
0x236f   :  { %v1628_v35 = vmul.f32 %v2667_v27, %v1626_v34  ;;  %v1954_v27 = vld [vmem:[%s3192_s7 + $0x8] sm:$0xff]  ;;  %s2775_s7 = smov [#allocation7]  }
0x2370   :  { %v2546_v28 = vpack.c.bf16 %v1954_v27, %v1953_v26  ;;  %s2054_s4 = sshll.u32 %s2775_s7, 4  ;;  %s2055_s4 = int_to_ptr.vmem [resolvable:$true] %s2054_s4 }
0x2371   :  { %1630 = vrot.lane.b32.xlu1 %v1628_v35, %s2773_s3  ;;  %s2716_s28 = scalar_lea.vmem %s2055_s4, 64  ;;  %p2721_p9 = scmp.lt.s32.totalorder %s2055_s4, %s2055_s4 }
0x2372   :  { %2547 = vmatprep.subr.bf16.mxu0 %v2546_v28  ;;  %p2717_p8 = scmp.ne.s32.totalorder %s2055_s4, %s2716_s28  ;;  %p2722_p10 = scmp.lt.s32.totalorder %s2716_s28, %s2716_s28 }
0x2374   :  { %p2723_p11 = por %p2722_p10, %p2721_p9 }
0x2376   :  { %p2724_p12 = pnand %p2723_p11, %p2717_p8 }
0x23e3   :  { %v1631_v36 = vpop.permute.xlu1 %1630 }
0x23e4   :  { %1633 = vst.msk [vmem:[#allocation3 + $0x8] sm:$0x3] %vm267_vm2, %v1631_v36  ;;  %2399 = vmatmul.mubr.msk.f32.vlgmr.msra.gmra.mrb[14].mxu1 %vm70_vm1, %v1631_v36 }
0x23e5   :  { %2542 = vmatpush3.bf16.msra.mxu1 %v3017_v53  ;;  %2420 = vmatprep.mubr.msk.f32.mxu1 %vm2770_vm0, %v2771_v1 }
0x23e6   :  { %2543 = vmatprep.subr.bf16.mxu1 %v2769_v0 }
0x23e9   :  { %2545 = vmatpush3.bf16.msra.mxu1 %v3023_v57 }
0x24b7   :  { %v1703_v38 = vpop.f32.mrb[14].mxu1 }
0x24b8   :  { %v1707_v39 = vadd.f32 %v1703_v38, %v1634_v37  ;;  %v2400_v40 = vpop.f32.mrb[15].mxu1 }
0x24ba   :  { %2670 = vtanh.f32 %v1707_v39  ;;  %v2119_v43 = vmul.f32 -1.442695, %v1707_v39 }
0x24bc   :  { %2672 = vpow2.f32 %v2119_v43 }
0x24c4   :  { %v2671_v41 = vpop.eup %2670 }
0x24c5   :  { %1717 = vrot.lane.b32.xlu0 %v2671_v41, %s2772_s25 }
0x24c6   :  { %v2673_v44 = vpop.eup %2672 }
0x24c7   :  { %v1711_v45 = vadd.f32 1.0, %v2673_v44 }
0x24c9   :  { %2674 = vrcp.f32 %v1711_v45 }
0x24d3   :  { %v2675_v53 = vpop.eup %2674 }
0x24d4   :  { %v1715_v0 = vmul.f32 %v2675_v53, %v1622_v32 }
0x2537   :  { %v1718_v46 = vpop.permute.xlu0 %1717 }
0x2538   :  { %v1720_v1 = vmul.f32 %v2675_v53, %v1718_v46 }
0x253a   :  { %1722 = vrot.lane.b32.xlu1 %v1720_v1, %s2773_s3 }
0x25ac   :  { %v1723_v57 = vpop.permute.xlu1 %1722 }
0x25ad   :  { %v1725_v47 = vadd.f32 %v1723_v57, %v1715_v0 }
0x25af   :  { %2676 = vtanh.f32 %v1725_v47 }
0x25b9   :  { %v2677_v48 = vpop.eup %2676 }
0x25ba   :  { %1728 = vrot.lane.b32.xlu0 %v2677_v48, %s2772_s25 }
0x262c   :  { %v1729_v49 = vpop.permute.xlu0 %1728 }
0x262d   :  { %v1731_v50 = vmul.f32 %v2675_v53, %v1729_v49 }
0x262f   :  { %1733 = vrot.lane.b32.xlu1 %v1731_v50, %s2773_s3 }
0x26a1   :  { %v1734_v51 = vpop.permute.xlu1 %1733 }
0x26a2   :  { %1736 = vst.msk [vmem:[#allocation3 + $0xa] sm:$0x3] %vm267_vm2, %v1734_v51  ;;  %2410 = vmatmul.mubr.msk.f32.vlgmr.msra.gmra.mrb[16].mxu0 %vm70_vm1, %v1734_v51 }
0x26a3   :  { %2431 = vmatprep.mubr.msk.f32.mxu0 %vm70_vm1, %v1951_v52  ;;  %2549 = vmatpush3.bf16.msra.mxu0 %v2546_v28 }
0x2775   :  { %v1806_v55 = vpop.f32.mrb[16].mxu0 }
0x2776   :  { %v1810_v56 = vadd.f32 %v1806_v55, %v1737_v54  ;;  %v2411_v58 = vpop.f32.mrb[17].mxu0 }
0x2778   :  { %2678 = vtanh.f32 %v1810_v56  ;;  %v2121_v12 = vmul.f32 -1.442695, %v1810_v56 }
0x277a   :  { %2680 = vpow2.f32 %v2121_v12 }
0x2782   :  { %v2679_v59 = vpop.eup %2678 }
0x2783   :  { %1820 = vrot.lane.b32.xlu0 %v2679_v59, %s2772_s25 }
0x2784   :  { %v2681_v60 = vpop.eup %2680 }
0x2785   :  { %v1814_v61 = vadd.f32 1.0, %v2681_v60 }
0x2787   :  { %2682 = vrcp.f32 %v1814_v61 }
0x2791   :  { %v2683_v62 = vpop.eup %2682 }
0x2792   :  { %v1818_v2 = vmul.f32 %v2683_v62, %v1725_v47 }
0x27f5   :  { %v1821_v63 = vpop.permute.xlu0 %1820 }
0x27f6   :  { %v1823_v14 = vmul.f32 %v2683_v62, %v1821_v63 }
0x27f8   :  { %1825 = vrot.lane.b32.xlu1 %v1823_v14, %s2773_s3 }
0x286a   :  { %v1826_v3 = vpop.permute.xlu1 %1825 }
0x286b   :  { %v1828_v4 = vadd.f32 %v1826_v3, %v1818_v2 }
0x286d   :  { %2684 = vtanh.f32 %v1828_v4 }
0x2877   :  { %v2685_v5 = vpop.eup %2684 }
0x2878   :  { %1831 = vrot.lane.b32.xlu0 %v2685_v5, %s2772_s25 }
0x28ea   :  { %v1832_v6 = vpop.permute.xlu0 %1831 }
0x28eb   :  { %v1834_v7 = vmul.f32 %v2683_v62, %v1832_v6 }
0x28ed   :  { %1836 = vrot.lane.b32.xlu1 %v1834_v7, %s2773_s3 }
0x295f   :  { %v1837_v8 = vpop.permute.xlu1 %1836 }
0x2960   :  { %1839 = vst.msk [vmem:[#allocation3 + $0xc] sm:$0x3] %vm267_vm2, %v1837_v8  ;;  %2421 = vmatmul.mubr.msk.f32.vlgmr.msra.gmra.mrb[16].mxu1 %vm70_vm1, %v1837_v8 }
0x2a33   :  { %v1909_v10 = vpop.f32.mrb[16].mxu1 }
0x2a34   :  { %v1913_v11 = vadd.f32 %v1909_v10, %v1840_v9  ;;  %v2422_v13 = vpop.f32.mrb[17].mxu1 }
0x2a36   :  { %2686 = vtanh.f32 %v1913_v11  ;;  %v2123_v16 = vmul.f32 -1.442695, %v1913_v11 }
0x2a38   :  { %2688 = vpow2.f32 %v2123_v16 }
0x2a40   :  { %v2687_v15 = vpop.eup %2686 }
0x2a41   :  { %1923 = vrot.lane.b32.xlu0 %v2687_v15, %s2772_s25 }
0x2a42   :  { %v2689_v17 = vpop.eup %2688 }
0x2a43   :  { %v1917_v18 = vadd.f32 1.0, %v2689_v17 }
0x2a45   :  { %2690 = vrcp.f32 %v1917_v18 }
0x2a4f   :  { %v2691_v19 = vpop.eup %2690 }
0x2a50   :  { %v1921_v22 = vmul.f32 %v2691_v19, %v1828_v4 }
0x2ab3   :  { %v1924_v20 = vpop.permute.xlu0 %1923 }
0x2ab4   :  { %v1926_v21 = vmul.f32 %v2691_v19, %v1924_v20 }
0x2ab6   :  { %1928 = vrot.lane.b32.xlu1 %v1926_v21, %s2773_s3 }
0x2b28   :  { %v1929_v23 = vpop.permute.xlu1 %1928 }
0x2b29   :  { %v1931_v24 = vadd.f32 %v1929_v23, %v1921_v22 }
0x2b2b   :  { %2692 = vtanh.f32 %v1931_v24 }
0x2b35   :  { %v2693_v25 = vpop.eup %2692 }
0x2b36   :  { %1934 = vrot.lane.b32.xlu0 %v2693_v25, %s2772_s25 }
0x2b3a   :  { %1006 = vrot.lane.b32.xlu0 %v3003_v42, %s2774_s6  ;;  %v2550_v42 = vpack.c.bf16 %v1956_v30, %v1955_v29 }
0x2b3c   :  { %2551 = vmatprep.subr.bf16.mxu0 %v2550_v42 }
0x2b3d   :  { %2553 = vmatpush3.bf16.msra.mxu0 %v2550_v42 }
0x2ba8   :  { %v1935_v31 = vpop.permute.xlu0 %1934 }
0x2ba9   :  { %v1937_v32 = vmul.f32 %v2691_v19, %v1935_v31 }
0x2bab   :  { %1939 = vrot.lane.b32.xlu1 %v1937_v32, %s2773_s3 }
0x2bac   :  { %v1007_v33 = vpop.permute.xlu0 %1006 }
0x2bad   :  { %1009 = vst.msk [vmem:[#allocation8] sm:$0x3] %vm267_vm2, %v1007_v33 }
0x2baf   :  { %1946 = vrot.lane.b32.xlu1 %v1931_v24, %s2774_s6 }
0x2c1d   :  { %v1940_v34 = vpop.permute.xlu1 %1939 }
0x2c1e   :  { %1942 = vst.msk [vmem:[#allocation3 + $0xe] sm:$0x3] %vm267_vm2, %v1940_v34  ;;  %1944 = vst.msk [vmem:[#allocation7 + $0x2] sm:$0x3] %vm267_vm2, %v1940_v34 }
0x2c21   :  { %v1947_v35 = vpop.permute.xlu1 %1946 }
0x2c22   :  { %1950 = vst.msk [vmem:[#allocation8 + $0x2] sm:$0x3] %vm267_vm2, %v1947_v35 }
0x2c25   :  { %v1952_v36 = vld [vmem:[#allocation3 + $0x8] sm:$0xff] }
0x2c26   :  { %2432 = vmatmul.mubr.msk.f32.vlgmr.msra.gmra.mrb[18].mxu0 %vm70_vm1, %v1952_v36 }
0x2c27   :  { %2727 = shalt.err (!%p2724_p12)
}
0x2c28   :  { %s2728_s14 = scalar_lea.hbm %s3197_s12, 64 }
0x2c29   :  { %p2729_p13 = scmp.ne.s32.totalorder %s3197_s12, %s2728_s14  ;;  %p2732_p0 = scmp.lt.u32.totalorder %s2728_s14, %s3197_s12 }
0x2c2b   :  { %p2734_p1 = pnand %p2732_p0, %p2729_p13 }
0x2c2d   :  { %2737 = shalt.err (!%p2734_p1)
}
0x2c2e   :  { %s2777_s19 = smov 2   ;;  %s2738_s5 = scalar_lea.vmem %s2067_s27, 64 }
0x2c2f   :  { %2060 = dma.vmem_to_hbm [thread:$0]  %s2055_s4, 64, %s3197_s12, [#allocation6], %s2773_s3, %s2773_s3, %s2777_s19  }
0x2c30   :  { %p2739_p2 = scmp.ne.s32.totalorder %s2067_s27, %s2738_s5  ;;  %p2743_p3 = scmp.lt.s32.totalorder %s2067_s27, %s2067_s27 }
0x2c31   :  { %p2744_p4 = scmp.lt.s32.totalorder %s2738_s5, %s2738_s5 }
0x2c33   :  { %p2745_p5 = por %p2744_p4, %p2743_p3 }
0x2c35   :  { %p2746_p6 = pnand %p2745_p5, %p2739_p2 }
0x2c37   :  { %2749 = shalt.err (!%p2746_p6)
}
0x2c38   :  { %s2750_s10 = scalar_lea.hbm %s3198_s13, 64 }
0x2c39   :  { %p2751_p7 = scmp.ne.s32.totalorder %s3198_s13, %s2750_s10  ;;  %p2754_p8 = scmp.lt.u32.totalorder %s2750_s10, %s3198_s13 }
0x2c3b   :  { %p2756_p9 = pnand %p2754_p8, %p2751_p7 }
0x2c3d   :  { %2759 = shalt.err (!%p2756_p9)
}
0x2c3e   :  { %2072 = dma.vmem_to_hbm [thread:$0]  %s2067_s27, 64, %s3198_s13, [#allocation9], %s2773_s3, %s2773_s3, %s2777_s19  }
0x2c3f   :  { %v2124_v37 = vld [vmem:[%s3193_s8] ss:$0 sm:$0xff] }
0x2cf9   :  { %v2433_v38 = vpop.f32.mrb[18].mxu0 }
0x2cfa   :  { %v2042_v39 = vadd.f32 %v2433_v38, %v2124_v37  ;;  %v2036_v40 = vpop.f32.mrb[19].mxu0 }
0x2cfb   :  { %v2037_v41 = vadd.f32 %v2124_v37, %v2036_v40 }
0x2cfc   :  { %2046 = vst [vmem:[%s3196_s11 + $0x8] sm:$0xff] %v2042_v39 }
0x2cfd   :  { %2045 = vst [vmem:[%s3196_s11] sm:$0xff] %v2037_v41 }
0x2cfe   :  { %2762 = dma.done.wait [#allocation6], 64  }
0x2cff   :  { %2763 = vsyncadd [#allocation6], 4294967232 }
0x2d00   :  { %2764 = dma.done.wait [#allocation9], 64  }
0x2d01   :  { %2765 = vsyncadd [#allocation9], 4294967232 }
0x2d02   :  { %2081 = vsyncpa [#allocation5], 1 }
0x2d03   :  { %2082 = vsyncpa [#allocation6], 1 }
0x2d04   :  { %2083 = vsyncpa [#allocation9], 1 }

</bundles_post_ra>
